<compile_context>
chip_gen: v7x
topology: tpu7x:2x2x1
jax: 0.10.0
libtpu: 0.0.40
codegen_flags: <defaults>
</compile_context>

<pallas_src>
import math
import functools

import jax
import jax.numpy as jnp
from jax.experimental import pallas as pl
from jax.experimental.pallas import tpu as pltpu


def encoder_block_kernel(xq_ref, xkv_ref, wqkv_ref, bqkv_ref, wo_ref, bo_ref,
                         g1_ref, be1_ref, w1_ref, b1_ref, w2_ref, b2_ref,
                         g2_ref, be2_ref, o_ref, *, num_heads):
    bf16 = jnp.bfloat16
    x_q = xq_ref[0].astype(jnp.float32)        # (TQ, D) residual-stream rows for this tile
    x_kv = xkv_ref[0]                          # (S, D) full-sequence context for K/V
    TQ, D = x_q.shape
    S = x_kv.shape[0]
    H = num_heads
    hd = D // H
    scale = 1.0 / math.sqrt(hd)

    xq_b = x_q.astype(bf16)
    xkv_b = x_kv.astype(bf16)

    # ---- QKV projections: full-width MXU matmuls, bf16 x bf16 -> f32 accumulate ----
    q_all = jnp.dot(xq_b, wqkv_ref[0], preferred_element_type=jnp.float32) + bqkv_ref[0]
    k_all = jnp.dot(xkv_b, wqkv_ref[1], preferred_element_type=jnp.float32) + bqkv_ref[1]
    v_all = jnp.dot(xkv_b, wqkv_ref[2], preferred_element_type=jnp.float32) + bqkv_ref[2]

    # Head split: static lane slices stacked on a new *major* head axis
    # (data movement only; all matmuls below are head-batched einsums).
    def split_heads(t):                        # (rows, D) -> (H, rows, hd)
        return jnp.stack([t[:, h * hd:(h + 1) * hd] for h in range(H)], axis=0)

    qh = split_heads(q_all).astype(bf16)       # (H, TQ, hd)
    kh = split_heads(k_all).astype(bf16)       # (H, S,  hd)
    vh = split_heads(v_all).astype(bf16)       # (H, S,  hd)

    # ---- scaled dot-product attention, batched over heads (mask=None) ----
    logits = jnp.einsum('hqe,hke->hqk', qh, kh,
                        preferred_element_type=jnp.float32) * scale   # (H, TQ, S) f32
    logits = logits - jnp.max(logits, axis=-1, keepdims=True)
    p = jnp.exp(logits)
    p = p * pl.reciprocal(jnp.sum(p, axis=-1, keepdims=True), approx=True)
    ctx = jnp.einsum('hqk,hke->hqe', p.astype(bf16), vh,
                     preferred_element_type=jnp.float32)              # (H, TQ, hd)

    # Output projection folded per head: concat_h(ctx_h) @ Wo == sum_h ctx_h @ Wo_h.
    attn_out = jnp.einsum('hqe,hed->hqd', ctx.astype(bf16), wo_ref[...],
                          preferred_element_type=jnp.float32).sum(axis=0) + bo_ref[...]

    # ---- residual + LayerNorm 1 (f32) ----
    y = x_q + attn_out
    mu = jnp.mean(y, axis=-1, keepdims=True)
    var = jnp.mean((y - mu) ** 2, axis=-1, keepdims=True)
    y = (y - mu) * jax.lax.rsqrt(var + 1e-5) * g1_ref[...] + be1_ref[...]

    # ---- feed-forward: Linear -> ReLU -> Linear (Dropout p=0 skipped) ----
    h1 = jnp.dot(y.astype(bf16), w1_ref[...], preferred_element_type=jnp.float32) + b1_ref[...]
    h1 = jnp.maximum(h1, 0.0)
    ffn = jnp.dot(h1.astype(bf16), w2_ref[...], preferred_element_type=jnp.float32) + b2_ref[...]

    # ---- residual + LayerNorm 2 (f32) ----
    z = y + ffn
    mu = jnp.mean(z, axis=-1, keepdims=True)
    var = jnp.mean((z - mu) ** 2, axis=-1, keepdims=True)
    z = (z - mu) * jax.lax.rsqrt(var + 1e-5) * g2_ref[...] + be2_ref[...]

    o_ref[0] = z.astype(o_ref.dtype)


def _prepare_weights(params, num_heads):
    """Re-arrange the packed qkv_proj weights (UvA per-head [q_h|k_h|v_h] column blocks)
    into head-major Q/K/V matrices, split Wo per head, and cast matmul weights to bf16."""
    D = params["wqkv"].shape[0]
    hd = D // num_heads
    w = params["wqkv"].reshape(D, num_heads, 3, hd)
    b = params["bqkv"].reshape(num_heads, 3, hd)
    wqkv3 = jnp.stack([w[:, :, c, :].reshape(D, D) for c in range(3)], axis=0)   # (3, D, D)
    bqkv3 = jnp.stack([b[:, c, :].reshape(1, D) for c in range(3)], axis=0)      # (3, 1, D)
    wo_h = params["wo"].reshape(num_heads, hd, D)                                # (H, hd, D)
    return (wqkv3.astype(jnp.bfloat16), bqkv3.astype(jnp.float32),
            wo_h.astype(jnp.bfloat16),
            params["w1"].astype(jnp.bfloat16), params["w2"].astype(jnp.bfloat16))


def encoder_block(x, params, num_heads, *, q_tile=None):
    B, S, D = x.shape
    F = params["w1"].shape[1]
    assert D % num_heads == 0, "input_dim must be divisible by num_heads"
    hd = D // num_heads
    if q_tile is None:
        q_tile = min(S, 128)
    assert S % q_tile == 0, "sequence length must be divisible by q_tile"
    n_q = S // q_tile

    wqkv3, bqkv3, wo_h, w1, w2 = _prepare_weights(params, num_heads)

    def full(rank):
        zeros = (0,) * rank
        return lambda shape: pl.BlockSpec(shape, lambda b, qi: zeros)
    full2, full3 = full(2), full(3)

    in_specs = [
        pl.BlockSpec((1, q_tile, D), lambda b, qi: (b, qi, 0)),   # x: query rows (this tile)
        pl.BlockSpec((1, S, D), lambda b, qi: (b, 0, 0)),         # x: full-seq K/V context
        full3((3, D, D)),             # wqkv  (head-major Q/K/V, bf16)
        full3((3, 1, D)),             # bqkv  (f32)
        full3((num_heads, hd, D)),    # wo per head (bf16)
        full2((1, D)),                # bo
        full2((1, D)), full2((1, D)),     # ln1 gamma, beta
        full2((D, F)), full2((1, F)),     # w1 (bf16), b1
        full2((F, D)), full2((1, D)),     # w2 (bf16), b2
        full2((1, D)), full2((1, D)),     # ln2 gamma, beta
    ]

    # Explicit VMEM budget: bf16 weights + per-tile activations, with double-buffer headroom,
    # clamped to stay within v7x's 64 MiB physical VMEM.
    weight_bytes = 2 * (3 * D * D + D * D + D * F + F * D)
    small_bytes = 4 * (3 * D + 7 * D + F)
    act_bytes = 4 * (3 * (q_tile + 2 * S) * D                 # q/k/v projections (f32)
                     + 2 * num_heads * q_tile * S             # logits + probs
                     + num_heads * q_tile * (hd + D)          # ctx + out-proj partials
                     + q_tile * F + 4 * q_tile * D)           # ffn hidden + residual/LN temps
    io_bytes = 2 * x.dtype.itemsize * (2 * q_tile * D + S * D)
    est = 2 * (weight_bytes + small_bytes + act_bytes + io_bytes)
    vmem_limit = int(min(max(est, 32 * 1024 * 1024), 64 * 1024 * 1024))

    kernel = functools.partial(encoder_block_kernel, num_heads=num_heads)
    return pl.pallas_call(
        kernel,
        out_shape=jax.ShapeDtypeStruct((B, S, D), x.dtype),
        grid_spec=pltpu.PrefetchScalarGridSpec(
            num_scalar_prefetch=0,
            grid=(B, n_q),
            in_specs=in_specs,
            out_specs=pl.BlockSpec((1, q_tile, D), lambda b, qi: (b, qi, 0)),
        ),
        compiler_params=pltpu.CompilerParams(
            dimension_semantics=("parallel", "parallel"),
            vmem_limit_bytes=vmem_limit,
        ),
    )(x, x, wqkv3, bqkv3, wo_h, params["bo"], params["g1"], params["be1"],
      w1, params["b1"], w2, params["b2"], params["g2"], params["be2"])


def reference_encoder_block(x, params, num_heads):
    """Pure-JAX reference mirroring the PyTorch forward pass; matmul operands are cast
    to bf16 with f32 accumulation exactly like the Pallas kernel."""
    bf16 = jnp.bfloat16
    B, S, D = x.shape
    hd = D // num_heads
    x = x.astype(jnp.float32)

    def mm(a, w):
        return jnp.einsum('...ij,jk->...ik', a.astype(bf16), w.astype(bf16),
                          preferred_element_type=jnp.float32)

    qkv = mm(x, params["wqkv"]) + params["bqkv"]                       # (B, S, 3D)
    qkv = qkv.reshape(B, S, num_heads, 3 * hd).transpose(0, 2, 1, 3)   # (B, H, S, 3hd)
    q, k, v = jnp.split(qkv, 3, axis=-1)
    logits = jnp.einsum('bhqe,bhke->bhqk', q.astype(bf16), k.astype(bf16),
                        preferred_element_type=jnp.float32) / math.sqrt(hd)
    attn = jax.nn.softmax(logits, axis=-1)
    ctx = jnp.einsum('bhqk,bhke->bhqe', attn.astype(bf16), v.astype(bf16),
                     preferred_element_type=jnp.float32)
    vals = ctx.transpose(0, 2, 1, 3).reshape(B, S, D)
    attn_out = mm(vals, params["wo"]) + params["bo"]

    def ln(y, g, b):
        mu = jnp.mean(y, axis=-1, keepdims=True)
        var = jnp.mean((y - mu) ** 2, axis=-1, keepdims=True)
        return (y - mu) * jax.lax.rsqrt(var + 1e-5) * g + b

    y = ln(x + attn_out, params["g1"], params["be1"])
    h1 = jnp.maximum(mm(y, params["w1"]) + params["b1"], 0.0)
    ffn = mm(h1, params["w2"]) + params["b2"]
    return ln(y + ffn, params["g2"], params["be2"])


if __name__ == "__main__":
    B, S, D = 2, 16, 128          # D multiple of 128 -> lane-dense, unmasked stores
    num_heads = 4
    dim_feedforward = 256
    q_tile = 8                    # 2 query tiles per batch -> grid (2, 2)

    key = jax.random.PRNGKey(0)
    keys = jax.random.split(key, 8)
    x = jax.random.normal(keys[0], (B, S, D), dtype=jnp.float32)

    params = {
        # nn.Linear weights (out, in) pre-transposed to (in, out); qkv packed per head as
        # [q_h | k_h | v_h] column blocks (UvA MultiHeadAttention layout).
        "wqkv": 0.02 * jax.random.normal(keys[1], (D, 3 * D), jnp.float32),
        "bqkv": 0.01 * jax.random.normal(keys[2], (1, 3 * D), jnp.float32),
        "wo":   0.02 * jax.random.normal(keys[3], (D, D), jnp.float32),
        "bo":   0.01 * jax.random.normal(keys[4], (1, D), jnp.float32),
        "g1":   jnp.ones((1, D), jnp.float32),
        "be1":  jnp.zeros((1, D), jnp.float32),
        "w1":   0.02 * jax.random.normal(keys[5], (D, dim_feedforward), jnp.float32),
        "b1":   0.01 * jax.random.normal(keys[6], (1, dim_feedforward), jnp.float32),
        "w2":   0.02 * jax.random.normal(keys[7], (dim_feedforward, D), jnp.float32),
        "b2":   jnp.zeros((1, D), jnp.float32),
        "g2":   jnp.ones((1, D), jnp.float32),
        "be2":  jnp.zeros((1, D), jnp.float32),
    }

    out = jax.block_until_ready(encoder_block(x, params, num_heads, q_tile=q_tile))
    ref = jax.block_until_ready(reference_encoder_block(x, params, num_heads))

    assert out.shape == (B, S, D)
    max_err = jnp.max(jnp.abs(out - ref))
    assert jnp.allclose(out, ref, atol=5e-3, rtol=5e-3), f"max abs diff {max_err}"
    print("KERNEL_OK")
</pallas_src>

<mosaic_0001>
module attributes {stable_mosaic.version = 11 : i64} {
  func.func @encoder_block_kernel(%arg0: i32, %arg1: i32, %arg2: memref<1x8x128xf32, #tpu.memory_space<vmem>>, %arg3: memref<1x16x128xf32, #tpu.memory_space<vmem>>, %arg4: memref<3x128x128xbf16, #tpu.memory_space<vmem>>, %arg5: memref<3x1x128xf32, #tpu.memory_space<vmem>>, %arg6: memref<4x32x128xbf16, #tpu.memory_space<vmem>>, %arg7: memref<1x128xf32, #tpu.memory_space<vmem>>, %arg8: memref<1x128xf32, #tpu.memory_space<vmem>>, %arg9: memref<1x128xf32, #tpu.memory_space<vmem>>, %arg10: memref<128x256xbf16, #tpu.memory_space<vmem>>, %arg11: memref<1x256xf32, #tpu.memory_space<vmem>>, %arg12: memref<256x128xbf16, #tpu.memory_space<vmem>>, %arg13: memref<1x128xf32, #tpu.memory_space<vmem>>, %arg14: memref<1x128xf32, #tpu.memory_space<vmem>>, %arg15: memref<1x128xf32, #tpu.memory_space<vmem>>, %arg16: memref<1x8x128xf32, #tpu.memory_space<vmem>>) attributes {dimension_semantics = [#tpu.dimension_semantics<parallel>, #tpu.dimension_semantics<parallel>], iteration_bounds = array<i64: 2, 2>, scalar_prefetch = 0 : i64, scratch_operands = 0 : i64, tpu.core_type = #tpu.core_type<tc>, window_params = [{transform_indices = @transform_0, window_bounds = array<i64: 1, 8, 128>}, {transform_indices = @transform_1, window_bounds = array<i64: 1, 16, 128>}, {pipeline_mode = #tpu.pipeline_mode<synchronous>, transform_indices = @transform_2, window_bounds = array<i64: 3, 128, 128>}, {pipeline_mode = #tpu.pipeline_mode<synchronous>, transform_indices = @transform_3, window_bounds = array<i64: 3, 1, 128>}, {pipeline_mode = #tpu.pipeline_mode<synchronous>, transform_indices = @transform_4, window_bounds = array<i64: 4, 32, 128>}, {pipeline_mode = #tpu.pipeline_mode<synchronous>, transform_indices = @transform_5, window_bounds = array<i64: 1, 128>}, {pipeline_mode = #tpu.pipeline_mode<synchronous>, transform_indices = @transform_6, window_bounds = array<i64: 1, 128>}, {pipeline_mode = #tpu.pipeline_mode<synchronous>, transform_indices = @transform_7, window_bounds = array<i64: 1, 128>}, {pipeline_mode = #tpu.pipeline_mode<synchronous>, transform_indices = @transform_8, window_bounds = array<i64: 128, 256>}, {pipeline_mode = #tpu.pipeline_mode<synchronous>, transform_indices = @transform_9, window_bounds = array<i64: 1, 256>}, {pipeline_mode = #tpu.pipeline_mode<synchronous>, transform_indices = @transform_10, window_bounds = array<i64: 256, 128>}, {pipeline_mode = #tpu.pipeline_mode<synchronous>, transform_indices = @transform_11, window_bounds = array<i64: 1, 128>}, {pipeline_mode = #tpu.pipeline_mode<synchronous>, transform_indices = @transform_12, window_bounds = array<i64: 1, 128>}, {pipeline_mode = #tpu.pipeline_mode<synchronous>, transform_indices = @transform_13, window_bounds = array<i64: 1, 128>}, {transform_indices = @transform_14, window_bounds = array<i64: 1, 8, 128>}]} {
    %c0 = arith.constant 0 : index
    %c0_0 = arith.constant 0 : index
    %c0_1 = arith.constant 0 : index
    %0 = vector.load %arg2[%c0, %c0_0, %c0_1] : memref<1x8x128xf32, #tpu.memory_space<vmem>>, vector<1x8x128xf32>
    %1 = vector.shape_cast %0 : vector<1x8x128xf32> to vector<8x128xf32>
    %c0_2 = arith.constant 0 : index
    %c0_3 = arith.constant 0 : index
    %c0_4 = arith.constant 0 : index
    %2 = vector.load %arg3[%c0_2, %c0_3, %c0_4] : memref<1x16x128xf32, #tpu.memory_space<vmem>>, vector<1x16x128xf32>
    %3 = vector.shape_cast %2 : vector<1x16x128xf32> to vector<16x128xf32>
    %4 = arith.truncf %1 : vector<8x128xf32> to vector<8x128xbf16>
    %5 = arith.truncf %3 : vector<16x128xf32> to vector<16x128xbf16>
    %c0_5 = arith.constant 0 : index
    %c0_6 = arith.constant 0 : index
    %c0_7 = arith.constant 0 : index
    %6 = vector.load %arg4[%c0_5, %c0_6, %c0_7] : memref<3x128x128xbf16, #tpu.memory_space<vmem>>, vector<1x128x128xbf16>
    %7 = vector.shape_cast %6 : vector<1x128x128xbf16> to vector<128x128xbf16>
    %cst = arith.constant dense<0.000000e+00> : vector<8x128xf32>
    %8 = tpu.matmul %4, %7, %cst {dimension_numbers = #tpu.dot_dimension_numbers<[1], [0], [0], [1], [0, 0, 1, 1], [], []>} : vector<8x128xbf16>, vector<128x128xbf16>, vector<8x128xf32> -> vector<8x128xf32>
    %c0_8 = arith.constant 0 : index
    %c0_9 = arith.constant 0 : index
    %c0_10 = arith.constant 0 : index
    %9 = vector.load %arg5[%c0_8, %c0_9, %c0_10] : memref<3x1x128xf32, #tpu.memory_space<vmem>>, vector<1x1x128xf32>
    %10 = vector.shape_cast %9 : vector<1x1x128xf32> to vector<1x128xf32>
    %11 = vector.broadcast %10 : vector<1x128xf32> to vector<8x128xf32>
    %12 = arith.addf %8, %11 : vector<8x128xf32>
    %c1 = arith.constant 1 : index
    %c0_11 = arith.constant 0 : index
    %c0_12 = arith.constant 0 : index
    %13 = vector.load %arg4[%c1, %c0_11, %c0_12] : memref<3x128x128xbf16, #tpu.memory_space<vmem>>, vector<1x128x128xbf16>
    %14 = vector.shape_cast %13 : vector<1x128x128xbf16> to vector<128x128xbf16>
    %cst_13 = arith.constant dense<0.000000e+00> : vector<16x128xf32>
    %15 = tpu.matmul %5, %14, %cst_13 {dimension_numbers = #tpu.dot_dimension_numbers<[1], [0], [0], [1], [0, 0, 1, 1], [], []>} : vector<16x128xbf16>, vector<128x128xbf16>, vector<16x128xf32> -> vector<16x128xf32>
    %c1_14 = arith.constant 1 : index
    %c0_15 = arith.constant 0 : index
    %c0_16 = arith.constant 0 : index
    %16 = vector.load %arg5[%c1_14, %c0_15, %c0_16] : memref<3x1x128xf32, #tpu.memory_space<vmem>>, vector<1x1x128xf32>
    %17 = vector.shape_cast %16 : vector<1x1x128xf32> to vector<1x128xf32>
    %18 = vector.broadcast %17 : vector<1x128xf32> to vector<16x128xf32>
    %19 = arith.addf %15, %18 : vector<16x128xf32>
    %c2 = arith.constant 2 : index
    %c0_17 = arith.constant 0 : index
    %c0_18 = arith.constant 0 : index
    %20 = vector.load %arg4[%c2, %c0_17, %c0_18] : memref<3x128x128xbf16, #tpu.memory_space<vmem>>, vector<1x128x128xbf16>
    %21 = vector.shape_cast %20 : vector<1x128x128xbf16> to vector<128x128xbf16>
    %cst_19 = arith.constant dense<0.000000e+00> : vector<16x128xf32>
    %22 = tpu.matmul %5, %21, %cst_19 {dimension_numbers = #tpu.dot_dimension_numbers<[1], [0], [0], [1], [0, 0, 1, 1], [], []>} : vector<16x128xbf16>, vector<128x128xbf16>, vector<16x128xf32> -> vector<16x128xf32>
    %c2_20 = arith.constant 2 : index
    %c0_21 = arith.constant 0 : index
    %c0_22 = arith.constant 0 : index
    %23 = vector.load %arg5[%c2_20, %c0_21, %c0_22] : memref<3x1x128xf32, #tpu.memory_space<vmem>>, vector<1x1x128xf32>
    %24 = vector.shape_cast %23 : vector<1x1x128xf32> to vector<1x128xf32>
    %25 = vector.broadcast %24 : vector<1x128xf32> to vector<16x128xf32>
    %26 = arith.addf %22, %25 : vector<16x128xf32>
    %27 = vector.extract_strided_slice %12 {offsets = [0, 0], sizes = [8, 32], strides = [1, 1]} : vector<8x128xf32> to vector<8x32xf32>
    %28 = vector.extract_strided_slice %12 {offsets = [0, 32], sizes = [8, 32], strides = [1, 1]} : vector<8x128xf32> to vector<8x32xf32>
    %29 = vector.extract_strided_slice %12 {offsets = [0, 64], sizes = [8, 32], strides = [1, 1]} : vector<8x128xf32> to vector<8x32xf32>
    %30 = vector.extract_strided_slice %12 {offsets = [0, 96], sizes = [8, 32], strides = [1, 1]} : vector<8x128xf32> to vector<8x32xf32>
    %31 = vector.shape_cast %27 : vector<8x32xf32> to vector<1x8x32xf32>
    %32 = vector.shape_cast %28 : vector<8x32xf32> to vector<1x8x32xf32>
    %33 = vector.shape_cast %29 : vector<8x32xf32> to vector<1x8x32xf32>
    %34 = vector.shape_cast %30 : vector<8x32xf32> to vector<1x8x32xf32>
    %35 = tpu.concatenate %31, %32, %33, %34 in 0 : vector<1x8x32xf32>, vector<1x8x32xf32>, vector<1x8x32xf32>, vector<1x8x32xf32> -> vector<4x8x32xf32>
    %36 = arith.truncf %35 : vector<4x8x32xf32> to vector<4x8x32xbf16>
    %37 = vector.extract_strided_slice %19 {offsets = [0, 0], sizes = [16, 32], strides = [1, 1]} : vector<16x128xf32> to vector<16x32xf32>
    %38 = vector.extract_strided_slice %19 {offsets = [0, 32], sizes = [16, 32], strides = [1, 1]} : vector<16x128xf32> to vector<16x32xf32>
    %39 = vector.extract_strided_slice %19 {offsets = [0, 64], sizes = [16, 32], strides = [1, 1]} : vector<16x128xf32> to vector<16x32xf32>
    %40 = vector.extract_strided_slice %19 {offsets = [0, 96], sizes = [16, 32], strides = [1, 1]} : vector<16x128xf32> to vector<16x32xf32>
    %41 = vector.shape_cast %37 : vector<16x32xf32> to vector<1x16x32xf32>
    %42 = vector.shape_cast %38 : vector<16x32xf32> to vector<1x16x32xf32>
    %43 = vector.shape_cast %39 : vector<16x32xf32> to vector<1x16x32xf32>
    %44 = vector.shape_cast %40 : vector<16x32xf32> to vector<1x16x32xf32>
    %45 = tpu.concatenate %41, %42, %43, %44 in 0 : vector<1x16x32xf32>, vector<1x16x32xf32>, vector<1x16x32xf32>, vector<1x16x32xf32> -> vector<4x16x32xf32>
    %46 = arith.truncf %45 : vector<4x16x32xf32> to vector<4x16x32xbf16>
    %47 = vector.extract_strided_slice %26 {offsets = [0, 0], sizes = [16, 32], strides = [1, 1]} : vector<16x128xf32> to vector<16x32xf32>
    %48 = vector.extract_strided_slice %26 {offsets = [0, 32], sizes = [16, 32], strides = [1, 1]} : vector<16x128xf32> to vector<16x32xf32>
    %49 = vector.extract_strided_slice %26 {offsets = [0, 64], sizes = [16, 32], strides = [1, 1]} : vector<16x128xf32> to vector<16x32xf32>
    %50 = vector.extract_strided_slice %26 {offsets = [0, 96], sizes = [16, 32], strides = [1, 1]} : vector<16x128xf32> to vector<16x32xf32>
    %51 = vector.shape_cast %47 : vector<16x32xf32> to vector<1x16x32xf32>
    %52 = vector.shape_cast %48 : vector<16x32xf32> to vector<1x16x32xf32>
    %53 = vector.shape_cast %49 : vector<16x32xf32> to vector<1x16x32xf32>
    %54 = vector.shape_cast %50 : vector<16x32xf32> to vector<1x16x32xf32>
    %55 = tpu.concatenate %51, %52, %53, %54 in 0 : vector<1x16x32xf32>, vector<1x16x32xf32>, vector<1x16x32xf32>, vector<1x16x32xf32> -> vector<4x16x32xf32>
    %56 = arith.truncf %55 : vector<4x16x32xf32> to vector<4x16x32xbf16>
    "tpu.trace_start"() <{level = 10 : i32, message = "hqe,hke->hqk"}> : () -> ()
    %cst_23 = arith.constant dense<0.000000e+00> : vector<4x8x16xf32>
    %57 = tpu.matmul %36, %46, %cst_23 {dimension_numbers = #tpu.dot_dimension_numbers<[2], [2], [1], [1], [0, 0, 0, 1, 1, 1], [0], [0]>} : vector<4x8x32xbf16>, vector<4x16x32xbf16>, vector<4x8x16xf32> -> vector<4x8x16xf32>
    "tpu.trace_stop"() : () -> ()
    %cst_24 = arith.constant 0.176776692 : f32
    %58 = vector.broadcast %cst_24 : f32 to vector<4x8x16xf32>
    %59 = arith.mulf %57, %58 : vector<4x8x16xf32>
    %cst_25 = arith.constant dense<0xFF800000> : vector<4x8xf32>
    %60 = vector.multi_reduction <maximumf>, %59, %cst_25 [2] : vector<4x8x16xf32> to vector<4x8xf32>
    %61 = vector.shape_cast %60 : vector<4x8xf32> to vector<4x8x1xf32>
    %62 = vector.broadcast %61 : vector<4x8x1xf32> to vector<4x8x16xf32>
    %63 = arith.subf %59, %62 : vector<4x8x16xf32>
    %64 = math.exp %63 : vector<4x8x16xf32>
    %cst_26 = arith.constant dense<0.000000e+00> : vector<4x8xf32>
    %65 = vector.multi_reduction <add>, %64, %cst_26 [2] : vector<4x8x16xf32> to vector<4x8xf32>
    %66 = vector.shape_cast %65 : vector<4x8xf32> to vector<4x8x1xf32>
    %67 = tpu.reciprocal %66 {approx = true} : vector<4x8x1xf32> -> vector<4x8x1xf32>
    %68 = vector.broadcast %67 : vector<4x8x1xf32> to vector<4x8x16xf32>
    %69 = arith.mulf %64, %68 : vector<4x8x16xf32>
    %70 = arith.truncf %69 : vector<4x8x16xf32> to vector<4x8x16xbf16>
    "tpu.trace_start"() <{level = 10 : i32, message = "hqk,hke->hqe"}> : () -> ()
    %cst_27 = arith.constant dense<0.000000e+00> : vector<4x8x32xf32>
    %71 = tpu.matmul %70, %56, %cst_27 {dimension_numbers = #tpu.dot_dimension_numbers<[2], [1], [1], [2], [0, 0, 0, 1, 1, 2], [0], [0]>} : vector<4x8x16xbf16>, vector<4x16x32xbf16>, vector<4x8x32xf32> -> vector<4x8x32xf32>
    "tpu.trace_stop"() : () -> ()
    %72 = arith.truncf %71 : vector<4x8x32xf32> to vector<4x8x32xbf16>
    %c0_28 = arith.constant 0 : index
    %c0_29 = arith.constant 0 : index
    %c0_30 = arith.constant 0 : index
    %73 = vector.load %arg6[%c0_28, %c0_29, %c0_30] : memref<4x32x128xbf16, #tpu.memory_space<vmem>>, vector<4x32x128xbf16>
    "tpu.trace_start"() <{level = 10 : i32, message = "hqe,hed->hqd"}> : () -> ()
    %cst_31 = arith.constant dense<0.000000e+00> : vector<4x8x128xf32>
    %74 = tpu.matmul %72, %73, %cst_31 {dimension_numbers = #tpu.dot_dimension_numbers<[2], [1], [1], [2], [0, 0, 0, 1, 1, 2], [0], [0]>} : vector<4x8x32xbf16>, vector<4x32x128xbf16>, vector<4x8x128xf32> -> vector<4x8x128xf32>
    "tpu.trace_stop"() : () -> ()
    %cst_32 = arith.constant dense<0.000000e+00> : vector<8x128xf32>
    %75 = vector.multi_reduction <add>, %74, %cst_32 [0] : vector<4x8x128xf32> to vector<8x128xf32>
    %c0_33 = arith.constant 0 : index
    %c0_34 = arith.constant 0 : index
    %76 = vector.load %arg7[%c0_33, %c0_34] : memref<1x128xf32, #tpu.memory_space<vmem>>, vector<1x128xf32>
    %77 = vector.broadcast %76 : vector<1x128xf32> to vector<8x128xf32>
    %78 = arith.addf %75, %77 : vector<8x128xf32>
    %79 = arith.addf %1, %78 : vector<8x128xf32>
    %cst_35 = arith.constant dense<0.000000e+00> : vector<8xf32>
    %80 = vector.multi_reduction <add>, %79, %cst_35 [1] : vector<8x128xf32> to vector<8xf32>
    %81 = vector.shape_cast %80 : vector<8xf32> to vector<8x1xf32>
    %cst_36 = arith.constant 1.280000e+02 : f32
    %82 = vector.broadcast %cst_36 : f32 to vector<8x1xf32>
    %83 = arith.divf %81, %82 : vector<8x1xf32>
    %84 = vector.broadcast %83 : vector<8x1xf32> to vector<8x128xf32>
    %85 = arith.subf %79, %84 : vector<8x128xf32>
    %86 = arith.mulf %85, %85 : vector<8x128xf32>
    %cst_37 = arith.constant dense<0.000000e+00> : vector<8xf32>
    %87 = vector.multi_reduction <add>, %86, %cst_37 [1] : vector<8x128xf32> to vector<8xf32>
    %88 = vector.shape_cast %87 : vector<8xf32> to vector<8x1xf32>
    %cst_38 = arith.constant 1.280000e+02 : f32
    %89 = vector.broadcast %cst_38 : f32 to vector<8x1xf32>
    %90 = arith.divf %88, %89 : vector<8x1xf32>
    %91 = vector.broadcast %83 : vector<8x1xf32> to vector<8x128xf32>
    %92 = arith.subf %79, %91 : vector<8x128xf32>
    %cst_39 = arith.constant 9.99999974E-6 : f32
    %93 = vector.broadcast %cst_39 : f32 to vector<8x1xf32>
    %94 = arith.addf %90, %93 : vector<8x1xf32>
    %95 = math.rsqrt %94 : vector<8x1xf32>
    %96 = vector.broadcast %95 : vector<8x1xf32> to vector<8x128xf32>
    %97 = arith.mulf %92, %96 : vector<8x128xf32>
    %c0_40 = arith.constant 0 : index
    %c0_41 = arith.constant 0 : index
    %98 = vector.load %arg8[%c0_40, %c0_41] : memref<1x128xf32, #tpu.memory_space<vmem>>, vector<1x128xf32>
    %99 = vector.broadcast %98 : vector<1x128xf32> to vector<8x128xf32>
    %100 = arith.mulf %97, %99 : vector<8x128xf32>
    %c0_42 = arith.constant 0 : index
    %c0_43 = arith.constant 0 : index
    %101 = vector.load %arg9[%c0_42, %c0_43] : memref<1x128xf32, #tpu.memory_space<vmem>>, vector<1x128xf32>
    %102 = vector.broadcast %101 : vector<1x128xf32> to vector<8x128xf32>
    %103 = arith.addf %100, %102 : vector<8x128xf32>
    %104 = arith.truncf %103 : vector<8x128xf32> to vector<8x128xbf16>
    %c0_44 = arith.constant 0 : index
    %c0_45 = arith.constant 0 : index
    %105 = vector.load %arg10[%c0_44, %c0_45] : memref<128x256xbf16, #tpu.memory_space<vmem>>, vector<128x256xbf16>
    %cst_46 = arith.constant dense<0.000000e+00> : vector<8x256xf32>
    %106 = tpu.matmul %104, %105, %cst_46 {dimension_numbers = #tpu.dot_dimension_numbers<[1], [0], [0], [1], [0, 0, 1, 1], [], []>} : vector<8x128xbf16>, vector<128x256xbf16>, vector<8x256xf32> -> vector<8x256xf32>
    %c0_47 = arith.constant 0 : index
    %c0_48 = arith.constant 0 : index
    %107 = vector.load %arg11[%c0_47, %c0_48] : memref<1x256xf32, #tpu.memory_space<vmem>>, vector<1x256xf32>
    %108 = vector.broadcast %107 : vector<1x256xf32> to vector<8x256xf32>
    %109 = arith.addf %106, %108 : vector<8x256xf32>
    %cst_49 = arith.constant 0.000000e+00 : f32
    %110 = vector.broadcast %cst_49 : f32 to vector<8x256xf32>
    %111 = arith.maximumf %109, %110 : vector<8x256xf32>
    %112 = arith.truncf %111 : vector<8x256xf32> to vector<8x256xbf16>
    %c0_50 = arith.constant 0 : index
    %c0_51 = arith.constant 0 : index
    %113 = vector.load %arg12[%c0_50, %c0_51] : memref<256x128xbf16, #tpu.memory_space<vmem>>, vector<256x128xbf16>
    %cst_52 = arith.constant dense<0.000000e+00> : vector<8x128xf32>
    %114 = tpu.matmul %112, %113, %cst_52 {dimension_numbers = #tpu.dot_dimension_numbers<[1], [0], [0], [1], [0, 0, 1, 1], [], []>} : vector<8x256xbf16>, vector<256x128xbf16>, vector<8x128xf32> -> vector<8x128xf32>
    %c0_53 = arith.constant 0 : index
    %c0_54 = arith.constant 0 : index
    %115 = vector.load %arg13[%c0_53, %c0_54] : memref<1x128xf32, #tpu.memory_space<vmem>>, vector<1x128xf32>
    %116 = vector.broadcast %115 : vector<1x128xf32> to vector<8x128xf32>
    %117 = arith.addf %114, %116 : vector<8x128xf32>
    %118 = arith.addf %103, %117 : vector<8x128xf32>
    %cst_55 = arith.constant dense<0.000000e+00> : vector<8xf32>
    %119 = vector.multi_reduction <add>, %118, %cst_55 [1] : vector<8x128xf32> to vector<8xf32>
    %120 = vector.shape_cast %119 : vector<8xf32> to vector<8x1xf32>
    %cst_56 = arith.constant 1.280000e+02 : f32
    %121 = vector.broadcast %cst_56 : f32 to vector<8x1xf32>
    %122 = arith.divf %120, %121 : vector<8x1xf32>
    %123 = vector.broadcast %122 : vector<8x1xf32> to vector<8x128xf32>
    %124 = arith.subf %118, %123 : vector<8x128xf32>
    %125 = arith.mulf %124, %124 : vector<8x128xf32>
    %cst_57 = arith.constant dense<0.000000e+00> : vector<8xf32>
    %126 = vector.multi_reduction <add>, %125, %cst_57 [1] : vector<8x128xf32> to vector<8xf32>
    %127 = vector.shape_cast %126 : vector<8xf32> to vector<8x1xf32>
    %cst_58 = arith.constant 1.280000e+02 : f32
    %128 = vector.broadcast %cst_58 : f32 to vector<8x1xf32>
    %129 = arith.divf %127, %128 : vector<8x1xf32>
    %130 = vector.broadcast %122 : vector<8x1xf32> to vector<8x128xf32>
    %131 = arith.subf %118, %130 : vector<8x128xf32>
    %cst_59 = arith.constant 9.99999974E-6 : f32
    %132 = vector.broadcast %cst_59 : f32 to vector<8x1xf32>
    %133 = arith.addf %129, %132 : vector<8x1xf32>
    %134 = math.rsqrt %133 : vector<8x1xf32>
    %135 = vector.broadcast %134 : vector<8x1xf32> to vector<8x128xf32>
    %136 = arith.mulf %131, %135 : vector<8x128xf32>
    %c0_60 = arith.constant 0 : index
    %c0_61 = arith.constant 0 : index
    %137 = vector.load %arg14[%c0_60, %c0_61] : memref<1x128xf32, #tpu.memory_space<vmem>>, vector<1x128xf32>
    %138 = vector.broadcast %137 : vector<1x128xf32> to vector<8x128xf32>
    %139 = arith.mulf %136, %138 : vector<8x128xf32>
    %c0_62 = arith.constant 0 : index
    %c0_63 = arith.constant 0 : index
    %140 = vector.load %arg15[%c0_62, %c0_63] : memref<1x128xf32, #tpu.memory_space<vmem>>, vector<1x128xf32>
    %141 = vector.broadcast %140 : vector<1x128xf32> to vector<8x128xf32>
    %142 = arith.addf %139, %141 : vector<8x128xf32>
    %c0_64 = arith.constant 0 : index
    %c0_65 = arith.constant 0 : index
    %c0_66 = arith.constant 0 : index
    %143 = vector.load %arg16[%c0_64, %c0_65, %c0_66] : memref<1x8x128xf32, #tpu.memory_space<vmem>>, vector<1x8x128xf32>
    %144 = vector.shape_cast %143 : vector<1x8x128xf32> to vector<8x128xf32>
    %145 = vector.shape_cast %142 : vector<8x128xf32> to vector<1x8x128xf32>
    tpu.vector_store %arg16[%c0_64, %c0_65, %c0_66], %145 {strides = array<i32>} : memref<1x8x128xf32, #tpu.memory_space<vmem>>, vector<1x8x128xf32>,
    return
  }
  func.func @transform_0(%arg0: i32, %arg1: i32) -> (i32, i32, i32) {
    %c0_i32 = arith.constant 0 : i32
    %c0_i32_0 = arith.constant 0 : i32
    return %arg0, %arg1, %c0_i32 : i32, i32, i32
  }
  func.func @transform_1(%arg0: i32, %arg1: i32) -> (i32, i32, i32) {
    %c0_i32 = arith.constant 0 : i32
    %c0_i32_0 = arith.constant 0 : i32
    %c0_i32_1 = arith.constant 0 : i32
    return %arg0, %c0_i32, %c0_i32_0 : i32, i32, i32
  }
  func.func @transform_2(%arg0: i32, %arg1: i32) -> (i32, i32, i32) {
    %c0_i32 = arith.constant 0 : i32
    %c0_i32_0 = arith.constant 0 : i32
    %c0_i32_1 = arith.constant 0 : i32
    %c0_i32_2 = arith.constant 0 : i32
    return %c0_i32, %c0_i32_0, %c0_i32_1 : i32, i32, i32
  }
  func.func @transform_3(%arg0: i32, %arg1: i32) -> (i32, i32, i32) {
    %c0_i32 = arith.constant 0 : i32
    %c0_i32_0 = arith.constant 0 : i32
    %c0_i32_1 = arith.constant 0 : i32
    %c0_i32_2 = arith.constant 0 : i32
    return %c0_i32, %c0_i32_0, %c0_i32_1 : i32, i32, i32
  }
  func.func @transform_4(%arg0: i32, %arg1: i32) -> (i32, i32, i32) {
    %c0_i32 = arith.constant 0 : i32
    %c0_i32_0 = arith.constant 0 : i32
    %c0_i32_1 = arith.constant 0 : i32
    %c0_i32_2 = arith.constant 0 : i32
    return %c0_i32, %c0_i32_0, %c0_i32_1 : i32, i32, i32
  }
  func.func @transform_5(%arg0: i32, %arg1: i32) -> (i32, i32) {
    %c0_i32 = arith.constant 0 : i32
    %c0_i32_0 = arith.constant 0 : i32
    %c0_i32_1 = arith.constant 0 : i32
    return %c0_i32, %c0_i32_0 : i32, i32
  }
  func.func @transform_6(%arg0: i32, %arg1: i32) -> (i32, i32) {
    %c0_i32 = arith.constant 0 : i32
    %c0_i32_0 = arith.constant 0 : i32
    %c0_i32_1 = arith.constant 0 : i32
    return %c0_i32, %c0_i32_0 : i32, i32
  }
  func.func @transform_7(%arg0: i32, %arg1: i32) -> (i32, i32) {
    %c0_i32 = arith.constant 0 : i32
    %c0_i32_0 = arith.constant 0 : i32
    %c0_i32_1 = arith.constant 0 : i32
    return %c0_i32, %c0_i32_0 : i32, i32
  }
  func.func @transform_8(%arg0: i32, %arg1: i32) -> (i32, i32) {
    %c0_i32 = arith.constant 0 : i32
    %c0_i32_0 = arith.constant 0 : i32
    %c0_i32_1 = arith.constant 0 : i32
    return %c0_i32, %c0_i32_0 : i32, i32
  }
  func.func @transform_9(%arg0: i32, %arg1: i32) -> (i32, i32) {
    %c0_i32 = arith.constant 0 : i32
    %c0_i32_0 = arith.constant 0 : i32
    %c0_i32_1 = arith.constant 0 : i32
    return %c0_i32, %c0_i32_0 : i32, i32
  }
  func.func @transform_10(%arg0: i32, %arg1: i32) -> (i32, i32) {
    %c0_i32 = arith.constant 0 : i32
    %c0_i32_0 = arith.constant 0 : i32
    %c0_i32_1 = arith.constant 0 : i32
    return %c0_i32, %c0_i32_0 : i32, i32
  }
  func.func @transform_11(%arg0: i32, %arg1: i32) -> (i32, i32) {
    %c0_i32 = arith.constant 0 : i32
    %c0_i32_0 = arith.constant 0 : i32
    %c0_i32_1 = arith.constant 0 : i32
    return %c0_i32, %c0_i32_0 : i32, i32
  }
  func.func @transform_12(%arg0: i32, %arg1: i32) -> (i32, i32) {
    %c0_i32 = arith.constant 0 : i32
    %c0_i32_0 = arith.constant 0 : i32
    %c0_i32_1 = arith.constant 0 : i32
    return %c0_i32, %c0_i32_0 : i32, i32
  }
  func.func @transform_13(%arg0: i32, %arg1: i32) -> (i32, i32) {
    %c0_i32 = arith.constant 0 : i32
    %c0_i32_0 = arith.constant 0 : i32
    %c0_i32_1 = arith.constant 0 : i32
    return %c0_i32, %c0_i32_0 : i32, i32
  }
  func.func @transform_14(%arg0: i32, %arg1: i32) -> (i32, i32, i32) {
    %c0_i32 = arith.constant 0 : i32
    %c0_i32_0 = arith.constant 0 : i32
    return %arg0, %arg1, %c0_i32 : i32, i32, i32
  }
}

</mosaic_0001>

<bundles_post_ra>
// kernel: tpu_custom_call.1
= control target key start
LH: loop header
LB: loop body
LE: loop exit
PB: predicated region body
PF: predicated region fallthrough
CT: control target
= control target key end

     0   :  { %s3836_s0 = inlined_call_operand.hbm [shape: f32[2,16,128], index: 0, kind: input, shape index: {}]   ;;  %s3837_s1 = inlined_call_operand.hbm [shape: f32[2,16,128], index: 1, kind: input, shape index: {}]   ;;  %s3838_s2 = inlined_call_operand.hbm [shape: bf16[3,128,128], index: 2, kind: input, shape index: {}]   ;;  %s3839_s3 = inlined_call_operand.vmem [shape: f32[3,1,128], index: 3, kind: input, shape index: {}]   ;;  %s3840_s4 = inlined_call_operand.hbm [shape: bf16[4,32,128], index: 4, kind: input, shape index: {}]   ;;  %s3841_s5 = inlined_call_operand.vmem [shape: f32[1,128], index: 5, kind: input, shape index: {}]   ;;  %s3842_s6 = inlined_call_operand.vmem [shape: f32[1,128], index: 6, kind: input, shape index: {}]   ;;  %s3843_s7 = inlined_call_operand.vmem [shape: f32[1,128], index: 7, kind: input, shape index: {}]   ;;  %s3844_s8 = inlined_call_operand.hbm [shape: bf16[128,256], index: 8, kind: input, shape index: {}]   ;;  %s3845_s9 = inlined_call_operand.vmem [shape: f32[1,256], index: 9, kind: input, shape index: {}]   ;;  %s3846_s10 = inlined_call_operand.hbm [shape: bf16[256,128], index: 10, kind: input, shape index: {}]   ;;  %s3847_s11 = inlined_call_operand.vmem [shape: f32[1,128], index: 11, kind: input, shape index: {}]   ;;  %s3848_s12 = inlined_call_operand.vmem [shape: f32[1,128], index: 12, kind: input, shape index: {}]   ;;  %s3849_s13 = inlined_call_operand.vmem [shape: f32[1,128], index: 13, kind: input, shape index: {}]   ;;  %s3850_s14 = inlined_call_operand.hbm [shape: f32[2,16,128], index: 14, kind: output, shape index: {}]  }
   0x1   :  { %3865 = sst [smem:[#allocation24_spill]] %s3836_s0 }
   0x2   :  { %3866 = sst [smem:[#allocation25_spill]] %s3837_s1 }
   0x3   :  { %3867 = sst [smem:[#allocation26_spill]] %s3838_s2 }
   0x4   :  { %3868 = sst [smem:[#allocation27_spill]] %s3839_s3 }
   0x5   :  { %3869 = sst [smem:[#allocation28_spill]] %s3840_s4 }
   0x6   :  { %3870 = sst [smem:[#allocation29_spill]] %s3841_s5 }
   0x7   :  { %3871 = sst [smem:[#allocation30_spill]] %s3842_s6 }
   0x8   :  { %3872 = sst [smem:[#allocation31_spill]] %s3843_s7 }
   0x9   :  { %3873 = sst [smem:[#allocation32_spill]] %s3844_s8 }
   0xa   :  { %3874 = sst [smem:[#allocation33_spill]] %s3845_s9 }
   0xb   :  { %3875 = sst [smem:[#allocation34_spill]] %s3846_s10 }
   0xc   :  { %3876 = sst [smem:[#allocation35_spill]] %s3847_s11 }
   0xd   :  { %3877 = sst [smem:[#allocation36_spill]] %s3848_s12 }
   0xe   :  { %3878 = sst [smem:[#allocation37_spill]] %s3849_s13 }
   0xf   :  { %3879 = sst [smem:[#allocation38_spill]] %s3850_s14 }
  0x10   :  { %19 = vsyncpa [#allocation3], 0 }
  0x11   :  { %21 = vsyncpa [#allocation3 + $0x1], 0 }
  0x12   :  { %22 = vsyncpa [#allocation6], 0 }
  0x13   :  { %24 = vsyncpa [#allocation6 + $0x1], 0 }
  0x14   :  { %25 = vsyncpa [#allocation9], 0 }
  0x15   :  { %26 = vsyncpa [#allocation12], 0 }
  0x16   :  { %27 = vsyncpa [#allocation4], 0 }
  0x17   :  { %29 = vsyncpa [#allocation4 + $0x1], 0  ;;  %s3232_s29 = smov 0   ;;  %s3234_s30 = smov 0  }
  0x18   :  { %s3236_s15 = smov 0   ;;  %s3238_s16 = smov 0  }
  0x19   :  { %s3240_s17 = smov 0   ;;  %s3242_s18 = smov 0  }
  0x1a   :  { %s3244_s19 = smov 0   ;;  %s3246_s20 = smov 0  }
  0x1b   :  { %s3248_s21 = smov 0   ;;  %s3250_s22 = smov 0  }
  0x1c   :  { %s3252_s23 = smov 0  }
  0x1d LB: > { %3880 = sst [smem:[#allocation20_spill]] %s3122_s19  ;;  %s3288_s24 = sadd.s32 4294967295, %s3138_s23   ;;  %s3138_s23 = sphi %s3252_s23, %s35_s23   ;;  %s3134_s22 = sphi %s3250_s22, %s3940_s22   ;;  %s3130_s21 = sphi %s3248_s21, %s3939_s21   ;;  %s3126_s20 = sphi %s3246_s20, %s3938_s20   ;;  %s3122_s19 = sphi %s3244_s19, %s3937_s19   ;;  %s3118_s18 = sphi %s3242_s18, %s3936_s18   ;;  %s3114_s17 = sphi %s3240_s17, %s3935_s17   ;;  %s3110_s16 = sphi %s3238_s16, %s3934_s16   ;;  %s3106_s15 = sphi %s3236_s15, %s3933_s15   ;;  %s3102_s30 = sphi %s3234_s30, %s3932_s30   ;;  %s3098_s29 = sphi %s3232_s29, %s3931_s29  }
  0x1e   : > { %3881 = sst [smem:[#allocation21_spill]] %s3126_s20  ;;  %p2218_p0 = scmp.ge.s32.totalorder %s3138_s23, 1 }
  0x1f   : > { %p3855_p1 = scmp.eq.s32.totalorder %s3288_s24, 0  ;;  %p386_p2 = scmp.lt.s32.totalorder %s3138_s23, 5 }
  0x20   : > { %s3140_s26 = smov [#allocation7]   ;;  %s3141_s14 = smov [#allocation8]  }
  0x21   : > { %p3293_p3 = pnand %p2218_p0, %p386_p2  ;;  %s398_s27 = sshll.u32 %s3140_s26, 4  ;;  %s3297_s27 = int_to_ptr.vmem [resolvable:$true] %s398_s27 }
  0x22   : > { %s414_s13 = sshll.u32 %s3141_s14, 4  ;;  %s3142_s12 = smov [#allocation10]   ;;  %s3307_s13 = int_to_ptr.vmem [resolvable:$true] %s414_s13 }
  0x23   : > { %s3882_s25 = scalar_select %p3293_p3, 1, 0 }
  0x24   : > { %p2570_p4 = pneg %p3293_p3  ;;  %s3309_s19 = sshll.u32 %s3142_s12, 4  ;;  %s437_s19 = int_to_ptr.vmem [resolvable:$true] %s3309_s19 }
  0x25   : > { %3883 = sst [smem:[#allocation22_spill]] %s3882_s25 }
  0x26   : > { %p3303_p5 = pnand %p2570_p4, %p3855_p1  ;;  %s3885_s2 = sld [smem:[#allocation26_spill]] }
  0x28   : > { %p3319_p7 = pneg %p3303_p5 }
  0x2c   : > { %s2828_s26 = scalar_lea.hbm %s3885_s2, 3072 }
  0x2d   : > { %p2829_p6 = scmp.ne.s32.totalorder %s3885_s2, %s2828_s26  ;;  %p2835_p10 = scmp.lt.u32.totalorder %s2828_s26, %s3885_s2 }
  0x2f   : > { %p2831_p8 = pnand %p3319_p7, %p2829_p6 }
  0x31   : > { %p2832_p9 = pneg %p2831_p8 }
  0x33   : > { %p2837_p11 = pnand %p2835_p10, %p2832_p9 }
  0x35   : > { %2840 = shalt.err (!%p2837_p11)
}
  0x36   : > { %s2841_s7 = scalar_lea.vmem %s3297_s27, 3072  ;;  %p2849_p2 = scmp.lt.s32.totalorder %s3297_s27, %s3297_s27 }
  0x37   : > { %p2842_p12 = scmp.ne.s32.totalorder %s3297_s27, %s2841_s7  ;;  %p2850_p4 = scmp.lt.s32.totalorder %s2841_s7, %s2841_s7 }
  0x39   : > { %p2844_p13 = pnand %p2842_p12, %p3319_p7  ;;  %p2851_p6 = por %p2850_p4, %p2849_p2 }
  0x3b   : > { %p2845_p0 = pneg %p2844_p13 }
  0x3d   : > { %p2852_p8 = pnand %p2851_p6, %p2845_p0 }
  0x3f   : > { %2855 = shalt.err (!%p2852_p8)
}
  0x40   : > { %s3857_s9 = smov 64   ;;  %s3858_s11 = smov 4  }
  0x41   : > { %2573 = dma.hbm_to_vmem [thread:$0]  (!%p3303_p5), %s3885_s2, 3072, %s3297_s27, [#allocation6], %s3857_s9, %s3857_s9, %s3858_s11  }
  0x42   : > { %s3887_s4 = sld [smem:[#allocation28_spill]] }
  0x48   : > { %s2856_s7 = scalar_lea.hbm %s3887_s4, 1024 }
  0x49   : > { %p2857_p9 = scmp.ne.s32.totalorder %s3887_s4, %s2856_s7  ;;  %p2863_p12 = scmp.lt.u32.totalorder %s2856_s7, %s3887_s4 }
  0x4b   : > { %p2859_p10 = pnand %p2857_p9, %p3319_p7 }
  0x4d   : > { %p2860_p11 = pneg %p2859_p10 }
  0x4f   : > { %p2865_p13 = pnand %p2863_p12, %p2860_p11 }
  0x51   : > { %2868 = shalt.err (!%p2865_p13)
}
  0x52   : > { %s2869_s27 = scalar_lea.vmem %s3307_s13, 1024  ;;  %p2877_p6 = scmp.lt.s32.totalorder %s3307_s13, %s3307_s13 }
  0x53   : > { %p2870_p0 = scmp.ne.s32.totalorder %s3307_s13, %s2869_s27  ;;  %p2878_p8 = scmp.lt.s32.totalorder %s2869_s27, %s2869_s27 }
  0x55   : > { %p2872_p2 = pnand %p2870_p0, %p3319_p7  ;;  %p2879_p9 = por %p2878_p8, %p2877_p6 }
  0x57   : > { %p2873_p4 = pneg %p2872_p2 }
  0x59   : > { %p2880_p10 = pnand %p2879_p9, %p2873_p4 }
  0x5b   : > { %2883 = shalt.err (!%p2880_p10)
}
  0x5c   : > { %2576 = dma.hbm_to_vmem [thread:$0]  (!%p3303_p5), %s3887_s4, 1024, %s3307_s13, [#allocation9], %s3857_s9, %s3857_s9, %s3858_s11  }
  0x5d   : > { %s3888_s8 = sld [smem:[#allocation32_spill]] }
  0x63   : > { %s2884_s20 = scalar_lea.hbm %s3888_s8, 2048 }
  0x64   : > { %p2885_p11 = scmp.ne.s32.totalorder %s3888_s8, %s2884_s20  ;;  %p2891_p0 = scmp.lt.u32.totalorder %s2884_s20, %s3888_s8 }
  0x66   : > { %p2887_p12 = pnand %p2885_p11, %p3319_p7 }
  0x68   : > { %p2888_p13 = pneg %p2887_p12 }
  0x6a   : > { %p2893_p2 = pnand %p2891_p0, %p2888_p13 }
  0x6c   : > { %2896 = shalt.err (!%p2893_p2)
}
  0x6d   : > { %s2897_s27 = scalar_lea.vmem %s437_s19, 2048  ;;  %p2905_p9 = scmp.lt.s32.totalorder %s437_s19, %s437_s19 }
  0x6e   : > { %p2898_p4 = scmp.ne.s32.totalorder %s437_s19, %s2897_s27  ;;  %p2906_p10 = scmp.lt.s32.totalorder %s2897_s27, %s2897_s27 }
  0x70   : > { %p2900_p6 = pnand %p2898_p4, %p3319_p7  ;;  %p2907_p1 = por %p2906_p10, %p2905_p9 }
  0x72   : > { %p2901_p8 = pneg %p2900_p6 }
  0x74   : > { %p2908_p3 = pnand %p2907_p1, %p2901_p8 }
  0x76   : > { %2911 = shalt.err (!%p2908_p3)
}
  0x77   : > { %s3859_s13 = smov 128   ;;  %s3860_s1 = smov 8  }
  0x78   : > { %2579 = dma.hbm_to_vmem [thread:$0]  (!%p3303_p5), %s3888_s8, 2048, %s437_s19, [#allocation9], %s3859_s13, %s3859_s13, %s3860_s1  }
  0x79   : > { %s3147_s25 = smov [#allocation11]   ;;  %s3889_s10 = sld [smem:[#allocation34_spill]] }
  0x7a   : > { %s452_s20 = sshll.u32 %s3147_s25, 4  ;;  %s453_s20 = int_to_ptr.vmem [resolvable:$true] %s452_s20 }
  0x7f   : > { %s2912_s12 = scalar_lea.hbm %s3889_s10, 2048 }
  0x80   : > { %p2913_p1 = scmp.ne.s32.totalorder %s3889_s10, %s2912_s12  ;;  %p2919_p12 = scmp.lt.u32.totalorder %s2912_s12, %s3889_s10 }
  0x82   : > { %p2915_p3 = pnand %p2913_p1, %p3319_p7 }
  0x84   : > { %p2916_p11 = pneg %p2915_p3 }
  0x86   : > { %p2921_p13 = pnand %p2919_p12, %p2916_p11 }
  0x88   : > { %2924 = shalt.err (!%p2921_p13)
}
  0x89   : > { %s2925_s19 = scalar_lea.vmem %s453_s20, 2048  ;;  %p2933_p6 = scmp.lt.s32.totalorder %s453_s20, %s453_s20 }
  0x8a   : > { %p2926_p0 = scmp.ne.s32.totalorder %s453_s20, %s2925_s19  ;;  %p2934_p8 = scmp.lt.s32.totalorder %s2925_s19, %s2925_s19 }
  0x8c   : > { %p2928_p2 = pnand %p2926_p0, %p3319_p7  ;;  %p2935_p9 = por %p2934_p8, %p2933_p6 }
  0x8e   : > { %p2929_p4 = pneg %p2928_p2 }
  0x90   : > { %p2936_p10 = pnand %p2935_p9, %p2929_p4 }
  0x92   : > { %2939 = shalt.err (!%p2936_p10)
}
  0x93   : > { %s3890_s3 = smov 4   ;;  %s3891_s5 = smov 64  }
  0x94   : > { %2582 = dma.hbm_to_vmem [thread:$0]  (!%p3303_p5), %s3889_s10, 2048, %s453_s20, [#allocation12], %s3891_s5, %s3891_s5, %s3890_s3  }
  0x95   : > { %s2217_s6 = sadd.s32 4294967294, %s3138_s23   ;;  %s44_s28 = sadd.s32 1, %s3130_s21 }
  0x96   : > { %p45_p7 = scmp.ge.s32.totalorder %s44_s28, 2  ;;  %s47_s25 = sadd.s32 1, %s3134_s22 }
  0x97   : > { %s56_s26 = sadd.s32 1, %s3118_s18  ;;  %p63_p1 = scmp.ne.s32.totalorder %s3118_s18, %s3114_s17 }
  0x98   : > { %s3942_s28 = smov (%p45_p7, %s44_s28), 0  ;;  %s3944_s25 = smov (!%p45_p7, %s47_s25), %s3134_s22 }
  0x99   : > { %s52_s20 = ssub.s32 %s3130_s21, %s3942_s28  ;;  %p64_p5 = scmp.eq.s32.totalorder %s3138_s23, 0 }
  0x9a   : > { %p49_p3 = scmp.ge.s32.totalorder %s3944_s25, 2  ;;  %p69_p11 = scmp.ne.s32.totalorder %s3114_s17, %s3110_s16 }
  0x9b   : > { %p3431_p12 = por %p64_p5, %p63_p1  ;;  %s82_s12 = sadd.s32 1, %s3106_s15 }
  0x9c   : > { %s3946_s25 = smov (%p49_p3, %s3944_s25), 0  ;;  %p3894_p13 = scmp.eq.s32.totalorder %s3288_s24, 0 }
  0x9d   : > { %3893 = sst [smem:[#allocation23_spill]] %s3946_s25  ;;  %p89_p2 = scmp.ne.s32.totalorder %s3106_s15, %s3102_s30 }
  0x9e   : > { %p3443_p0 = por %p3894_p13, %p69_p11  ;;  %s51_s27 = ssub.s32 %s3134_s22, %s3946_s25 }
  0x9f   : > { %p95_p4 = scmp.ne.s32.totalorder %s3102_s30, %s3098_s29  ;;  %s53_s19 = sor.u32 %s52_s20, %s51_s27 }
  0xa0   : > { %s3895_s7 = scalar_select %p3443_p0, 1, 0 }
  0xa1   : > { %p80_p6 = scmp.eq.s32.totalorder %s51_s27, 0  ;;  %p54_p8 = scmp.eq.s32.totalorder %s53_s19, 0 }
  0xa2   : > { %p3455_p9 = por %p89_p2, %p64_p5  ;;  %p3897_p10 = pmov %p3894_p13 }
  0xa3   : > { %s3460_s5 = scalar_select %p80_p6, %s3106_s15, %s82_s12  }
  0xa4   : > { %s3463_s9 = scalar_select %p54_p8, %s3118_s18, %s56_s26  }
  0xa5   : > { %p3467_p7 = por %p95_p4, %p3897_p10  ;;  %p373_p3 = scmp.eq.s32.totalorder %s3288_s24, 3 }
  0xa6   : > { %p379_p13 = scmp.eq.s32.totalorder %s2217_s6, 3  ;;  %p2598_p5 = scmp.lt.s32.totalorder %s3138_s23, 4 }
  0xa7   : > { %s3898_s11 = scalar_select %p3467_p7, 1, 0 }
  0xa8   : > { %p3476_p2 = por %p373_p3, %p63_p1  ;;  %s475_s26 = sand.u32 1, %s3118_s18  }
  0xa9   : > { %p3484_p6 = por %p379_p13, %p69_p11  ;;  %s2224_s12 = sshll.u32 %s475_s26, 3 }
  0xaa   : > { %s3899_s29 = scalar_select %p3476_p2, 1, 0 }
  0xab   : > { %s3900_s20 = scalar_select %p3484_p6, 1, 0 }
  0xac   : > { %s2225_s27 = sshll.u32 %s3134_s22, 1  ;;  %s479_s1 = scalar_lea.vmem [#allocation2], %s2224_s12 }
  0xad   : > { %s484_s19 = sadd.s32 %s3130_s21, %s2225_s27  ;;  %s488_s2 = sshll.u32 %s479_s1, 4  ;;  %s3495_s2 = int_to_ptr.vmem [resolvable:$true] %s488_s2 }
  0xae   : > { %s2226_s13 = sshll.u32 %s484_s19, 7  ;;  %s3901_s0 = sld [smem:[#allocation24_spill]] }
  0xaf   : > { %p3501_p1 = pnand %p2598_p5, %p3431_p12  ;;  %p3509_p11 = pnand %p2598_p5, %p3455_p9 }
  0xb0   : > { %s497_s1 = sand.u32 1, %s3106_s15   ;;  %s476_s12 = scalar_lea.sflag [#allocation3], %s475_s26 }
  0xb1   : > { %p2942_p8 = pneg %p3501_p1 }
  0xb4   : > { %s3493_s8 = scalar_lea.hbm %s3901_s0, %s2226_s13  ;;  %s495_s13 = sand.u32 1, %s3138_s23  }
  0xb5   : > { %s2940_s27 = scalar_lea.hbm %s3493_s8, 128  ;;  %s2945_s19 = scalar_lea.hbm %s3901_s0, 512 }
  0xb6   : > { %p2941_p4 = scmp.ne.s32.totalorder %s3493_s8, %s2940_s27  ;;  %p2946_p9 = scmp.lt.u32.totalorder %s3493_s8, %s3901_s0 }
  0xb7   : > { %p2947_p3 = scmp.lt.u32.totalorder %s2945_s19, %s2940_s27  ;;  %p2949_p5 = scmp.lt.u32.totalorder %s2940_s27, %s3493_s8 }
  0xb8   : > { %p2943_p12 = pnand %p2942_p8, %p2941_p4 }
  0xb9   : > { %p2948_p13 = por %p2947_p3, %p2946_p9 }
  0xba   : > { %p2944_p10 = pneg %p2943_p12 }
  0xbb   : > { %p2950_p6 = por %p2949_p5, %p2948_p13 }
  0xbd   : > { %p2951_p2 = pnand %p2950_p6, %p2944_p10 }
  0xbf   : > { %2954 = shalt.err (!%p2951_p2)
}
  0xc0   : > { %s2955_s26 = scalar_lea.vmem %s3495_s2, 128  ;;  %s3148_s14 = smov [#allocation2]  }
  0xc1   : > { %p2956_p4 = scmp.ne.s32.totalorder %s3495_s2, %s2955_s26  ;;  %s2960_s3 = sshll.u32 %s3148_s14, 4  ;;  %s2961_s3 = int_to_ptr.vmem [resolvable:$false] %s2960_s3 }
  0xc2   : > { %s2962_s25 = scalar_lea.vmem %s2961_s3, 256  ;;  %p2963_p0 = scmp.lt.s32.totalorder %s3495_s2, %s2961_s3 }
  0xc3   : > { %p2958_p12 = pnand %p2956_p4, %p2942_p8  ;;  %p2964_p9 = scmp.lt.s32.totalorder %s2962_s25, %s2955_s26 }
  0xc5   : > { %p2959_p7 = pneg %p2958_p12  ;;  %p2965_p3 = por %p2964_p9, %p2963_p0 }
  0xc7   : > { %p2966_p13 = pnand %p2965_p3, %p2959_p7 }
  0xc9   : > { %2969 = shalt.err (!%p2966_p13)
}
  0xca   : > { %2586 = dma.hbm_to_vmem [thread:$0]  (!%p3501_p1), %s3493_s8, 128, %s3495_s2, %s476_s12  }
  0xcb   : > { %s2227_s27 = sshll.u32 %s497_s1, 4  ;;  %s2330_s19 = sshll.u32 %s3134_s22, 8 }
  0xcc   : > { %s3904_s3 = sld [smem:[#allocation25_spill]]  ;;  %s499_s10 = scalar_lea.vmem [#allocation5], %s2227_s27 }
  0xcd   : > { %s506_s25 = sshll.u32 %s499_s10, 4  ;;  %s3552_s0 = scalar_lea.sflag [#allocation6], %s495_s13  ;;  %s3548_s25 = int_to_ptr.vmem [resolvable:$true] %s506_s25 }
  0xce   : > { %p2972_p7 = pneg %p3509_p11 }
  0xd2   : > { %s3546_s26 = scalar_lea.hbm %s3904_s3, %s2330_s19  ;;  %s2975_s12 = scalar_lea.hbm %s3904_s3, 512 }
  0xd3   : > { %s2970_s2 = scalar_lea.hbm %s3546_s26, 256  ;;  %p2976_p1 = scmp.lt.u32.totalorder %s3546_s26, %s3904_s3 }
  0xd4   : > { %p2971_p0 = scmp.ne.s32.totalorder %s3546_s26, %s2970_s2  ;;  %p2977_p8 = scmp.lt.u32.totalorder %s2975_s12, %s2970_s2 }
  0xd5   : > { %p2979_p5 = scmp.lt.u32.totalorder %s2970_s2, %s3546_s26 }
  0xd6   : > { %p2973_p2 = pnand %p2972_p7, %p2971_p0  ;;  %p2978_p10 = por %p2977_p8, %p2976_p1 }
  0xd8   : > { %p2974_p6 = pneg %p2973_p2  ;;  %p2980_p4 = por %p2979_p5, %p2978_p10 }
  0xda   : > { %p2981_p12 = pnand %p2980_p4, %p2974_p6 }
  0xdc   : > { %2984 = shalt.err (!%p2981_p12)
}
  0xdd   : > { %s2985_s13 = scalar_lea.vmem %s3548_s25, 256  ;;  %s3149_s6 = smov [#allocation5]  }
  0xde   : > { %p2986_p9 = scmp.ne.s32.totalorder %s3548_s25, %s2985_s13  ;;  %s2990_s14 = sshll.u32 %s3149_s6, 4  ;;  %s2991_s14 = int_to_ptr.vmem [resolvable:$false] %s2990_s14 }
  0xdf   : > { %s2992_s10 = scalar_lea.vmem %s2991_s14, 512  ;;  %p2993_p0 = scmp.lt.s32.totalorder %s3548_s25, %s2991_s14 }
  0xe0   : > { %p2988_p3 = pnand %p2986_p9, %p2972_p7  ;;  %p2994_p2 = scmp.lt.s32.totalorder %s2992_s10, %s2985_s13 }
  0xe2   : > { %p2989_p13 = pneg %p2988_p3  ;;  %p2995_p1 = por %p2994_p2, %p2993_p0 }
  0xe4   : > { %p2996_p8 = pnand %p2995_p1, %p2989_p13 }
  0xe6   : > { %2999 = shalt.err (!%p2996_p8)
}
  0xe7   : > { %s3905_s2 = smov 8   ;;  %s3906_s8 = smov 128  }
  0xe8   : > { %2589 = dma.hbm_to_vmem [thread:$0]  (!%p3509_p11), %s3546_s26, 256, %s3548_s25, %s3552_s0, %s3906_s8, %s3906_s8, %s3905_s2  }
  0xe9   : > { %s3907_s1 = sld [smem:[#allocation22_spill]] }
  0xef   : > { %p3908_p7 = scmp.ne.s32.totalorder %s3907_s1, 0 }
  0xf0   : > { %s3586_s12 = sand.u32 (!%p3908_p7), 1, %s3114_s17   ;;  %p3909_p6 = scmp.ne.s32.totalorder (!%p3908_p7), %s3895_s7, 0 }
  0xf1   : > { %518 = sbr.rel (%p3908_p7) target bundleno = 2698 (0xa8a), region = 76  ;;  %s2231_s19 = sshll.u32 (!%p3908_p7), %s3586_s12, 3 }
  0xf2   : > { %s521_s27 = scalar_lea.sflag (!%p3908_p7), [#allocation3], %s3586_s12  ;;  %s3592_s4 = scalar_lea.vmem (!%p3908_p7), [#allocation2], %s2231_s19 }
  0xf8   : > { %3073 = dma.done.wait (%p3909_p6), %s521_s27, 128  }
  0xf9   : > { %3075 = vsyncadd (%p3909_p6), %s521_s27, 4294967168  ;;  %s529_s0 = sand.u32 1, %s3288_s24   ;;  %s531_s26 = sand.u32 1, %s3102_s30  }
  0xfa   : > { %s3600_s25 = sshll.u32 %s531_s26, 4  ;;  %s530_s13 = scalar_lea.sflag [#allocation6], %s529_s0 }
  0xfb   : > { %s533_s6 = scalar_lea.vmem [#allocation5], %s3600_s25  ;;  %p3910_p11 = scmp.ne.s32.totalorder %s3898_s11, 0 }
  0xfd   : > { %3077 = dma.done.wait (%p3910_p11), %s530_s13, 256  }
  0xfe   : > { %3079 = vsyncadd (%p3910_p11), %s530_s13, 4294967040  ;;  %p3911_p10 = scmp.eq.s32.totalorder %s3288_s24, 0 }
 0x100   : > { %3081 = dma.done.wait (%p3911_p10), [#allocation6], 3072   ;;  %p3912_p5 = pmov %p3911_p10 }
 0x102   : > { %3083 = vsyncadd (%p3912_p5), [#allocation6], 4294964224  ;;  %p3913_p4 = pmov %p3912_p5 }
 0x104   : > { %3085 = dma.done.wait (%p3913_p4), [#allocation9], 3072   ;;  %p3914_p12 = pmov %p3913_p4 }
 0x105   : > { %p3915_p9 = pmov %p3913_p4 }
 0x106   : > { %3087 = vsyncadd (%p3914_p12), [#allocation9], 4294964224 }
 0x107   : > { %3089 = dma.done.wait (%p3915_p9), [#allocation12], 2048   ;;  %p3916_p3 = pmov %p3913_p4 }
 0x108   : > { %v3150_v0 = vmov 0.0   ;;  %vm3151_vm0 = vmmov 0   ;;  %v2736_v1 = vld [vmem:[#allocation7 + $0x40] sm:$0xff]   ;;  %v2737_v2 = vld [vmem:[#allocation7 + $0x48] sm:$0xff]   ;;  %v2739_v5 = vld [vmem:[#allocation7 + $0x50] sm:$0xff]   ;;  %s3917_s11 = sld [smem:[#allocation27_spill]] }
 0x109   : > { %3091 = vsyncadd (%p3916_p3), [#allocation12], 4294965248  ;;  %2428 = vmatprep.subr.bf16.mxu1 %v3150_v0  ;;  %2408 = vmatprep.subr.bf16.mxu0 %v3150_v0  ;;  %v2738_v3 = vld [vmem:[#allocation7] sm:$0xff]   ;;  %v2740_v4 = vld [vmem:[#allocation7 + $0x8] sm:$0xff]   ;;  %vm1006_vm1 = vcmask 261120   ;;  %s3152_s2 = smov 64  }
 0x10a   : > { %2444 = vmatprep.mubr.msk.bf16.mxu1 %vm3151_vm0, %v3150_v0  ;;  %2424 = vmatprep.mubr.msk.bf16.mxu0 %vm3151_vm0, %v3150_v0  ;;  %v2742_v6 = vld [vmem:[#allocation7 + $0x10] sm:$0xff]   ;;  %v2741_v7 = vld [vmem:[#allocation7 + $0x58] sm:$0xff]   ;;  %v2743_v9 = vld [vmem:[#allocation7 + $0x60] sm:$0xff]   ;;  %s3153_s8 = smov 96   ;;  %s3154_s1 = smov 32   ;;  %vm1195_vm2 = vcmask 130048  }
 0x10b   : > { %2429 = vmatpush3.bf16.msra.mxu1 %v2736_v1  ;;  %2409 = vmatpush3.bf16.msra.mxu0 %v2738_v3  ;;  %v2744_v8 = vld [vmem:[#allocation7 + $0x18] sm:$0xff]   ;;  %v2746_v10 = vld [vmem:[#allocation7 + $0x20] sm:$0xff]   ;;  %v2745_v11 = vld [vmem:[#allocation7 + $0x68] sm:$0xff]   ;;  %s3918_s25 = sld [smem:[#allocation29_spill]]  ;;  %s3919_s24 = sld [smem:[#allocation30_spill]] }
 0x10c   : > { %2430 = vmatprep.subr.bf16.mxu1 %v3150_v0  ;;  %2410 = vmatprep.subr.bf16.mxu0 %v3150_v0  ;;  %v2748_v12 = vld [vmem:[#allocation7 + $0x28] sm:$0xff]   ;;  %v2747_v13 = vld [vmem:[#allocation7 + $0x70] sm:$0xff]   ;;  %v2749_v15 = vld [vmem:[#allocation7 + $0x78] sm:$0xff]   ;;  %s3920_s10 = sld [smem:[#allocation31_spill]]  ;;  %s3922_s0 = sld [smem:[#allocation35_spill]] }
 0x10d   : > { %v2750_v14 = vld [vmem:[#allocation7 + $0x30] sm:$0xff]   ;;  %v602_v17 = vld [vmem:[%s533_s6 + $0x8] sm:$0xff]  ;;  %v2752_v22 = vld [vmem:[#allocation7 + $0x80] sm:$0xff]   ;;  %s3923_s26 = sld [smem:[#allocation21_spill]]  ;;  %s3925_s14 = sld [smem:[#allocation36_spill]] }
 0x10e   : > { %v601_v16 = vld [vmem:[%s533_s6] sm:$0xff]  ;;  %v2751_v18 = vld [vmem:[#allocation7 + $0x38] sm:$0xff]   ;;  %v2753_v23 = vld [vmem:[#allocation7 + $0x88] sm:$0xff]   ;;  %s598_s27 = scalar_lea.vmem [#allocation13], %s2231_s19  ;;  %p3928_p0 = scmp.ne.s32.totalorder %s3899_s29, 0 }
 0x10f   : > { %2431 = vmatpush3.bf16.msra.mxu1 %v2737_v2  ;;  %2411 = vmatpush3.bf16.msra.mxu0 %v2740_v4  ;;  %v3642_v19 = vld [vmem:[%s3592_s4] sm:$0xff]  ;;  %v3645_v20 = vpack.c.bf16 %v602_v17, %v601_v16  ;;  %v2756_v37 = vld [vmem:[#allocation7 + $0xa0] sm:$0xff]   ;;  %v2757_v43 = vld [vmem:[#allocation7 + $0xa8] sm:$0xff]   ;;  %s2070_s4 = sshll.u32 %s598_s27, 4  ;;  %s3156_s19 = smov [#allocation13]   ;;  %s3775_s4 = int_to_ptr.vmem [resolvable:$true] %s2070_s4 }
 0x110   : > { %2432 = vmatprep.subr.bf16.mxu1 %v3150_v0  ;;  %2412 = vmatprep.subr.bf16.mxu0 %v3150_v0  ;;  %v603_v21 = vpack.c.bf16 %v3642_v19, %v3642_v19  ;;  %v2754_v24 = vld [vmem:[#allocation7 + $0x90] sm:$0xff]   ;;  %v2755_v25 = vld [vmem:[#allocation7 + $0x98] sm:$0xff]   ;;  %s3000_s7 = scalar_lea.vmem %s3775_s4, 128 }
 0x111   : > { %v2248_v26 = vld [vmem:[%s3917_s11 + $0x1] ss:$0 sm:$0xff]  ;;  %v2238_v35 = vld [vmem:[%s3917_s11] ss:$0 sm:$0xff]  ;;  %v2759_v46 = vld [vmem:[#allocation7 + $0xb8] sm:$0xff]   ;;  %p3001_p13 = scmp.ne.s32.totalorder %s3775_s4, %s3000_s7 }
 0x112   : > { %v2758_v44 = vld [vmem:[#allocation7 + $0xb0] sm:$0xff]  }
 0x113   : > { %2433 = vmatpush3.bf16.msra.mxu1 %v2739_v5  ;;  %2413 = vmatpush3.bf16.msra.mxu0 %v2742_v6  ;;  %s2326_s13 = sshll.u32 %s3923_s26, 1  ;;  %p3002_p2 = pnand %p3001_p13, %p3928_p0 }
 0x114   : > { %2434 = vmatprep.subr.bf16.mxu1 %v3150_v0  ;;  %2414 = vmatprep.subr.bf16.mxu0 %v3150_v0 }
 0x115   : > { %p3003_p1 = pneg %p3002_p2 }
 0x117   : > { %2435 = vmatpush3.bf16.msra.mxu1 %v2741_v7  ;;  %2415 = vmatpush3.bf16.msra.mxu0 %v2744_v8 }
 0x118   : > { %2436 = vmatprep.subr.bf16.mxu1 %v3150_v0  ;;  %2416 = vmatprep.subr.bf16.mxu0 %v3150_v0 }
 0x11b   : > { %2437 = vmatpush3.bf16.msra.mxu1 %v2743_v9  ;;  %2417 = vmatpush3.bf16.msra.mxu0 %v2746_v10 }
 0x11c   : > { %2438 = vmatprep.subr.bf16.mxu1 %v3150_v0  ;;  %2418 = vmatprep.subr.bf16.mxu0 %v3150_v0 }
 0x11f   : > { %2439 = vmatpush3.bf16.msra.mxu1 %v2745_v11  ;;  %2419 = vmatpush3.bf16.msra.mxu0 %v2748_v12 }
 0x120   : > { %2440 = vmatprep.subr.bf16.mxu1 %v3150_v0  ;;  %2420 = vmatprep.subr.bf16.mxu0 %v3150_v0 }
 0x123   : > { %2441 = vmatpush3.bf16.msra.mxu1 %v2747_v13  ;;  %2421 = vmatpush3.bf16.msra.mxu0 %v2750_v14 }
 0x124   : > { %2442 = vmatprep.subr.bf16.mxu1 %v3150_v0  ;;  %2422 = vmatprep.subr.bf16.mxu0 %v3150_v0 }
 0x127   : > { %2443 = vmatpush3.bf16.msra.mxu1 %v2749_v15  ;;  %2423 = vmatpush3.bf16.msra.mxu0 %v2751_v18  ;;  %v2258_v15 = vld [vmem:[%s3917_s11 + $0x2] ss:$0 sm:$0xff] }
 0x128   : > { %2468 = vmatprep.subr.bf16.mxu1 %v3150_v0  ;;  %2448 = vmatprep.subr.bf16.mxu0 %v3150_v0 }
 0x12a   : > { %2445 = vmatmul.mubr.bf16.vlgmr.msra.gmra.mrb[0].mxu1 %v3645_v20  ;;  %2425 = vmatmul.mubr.bf16.vlgmr.msra.gmra.mrb[0].mxu0 %v603_v21 }
 0x12b   : > { %2470 = vmatprep.mubr.msk.bf16.mxu1 %vm3151_vm0, %v3150_v0  ;;  %2464 = vmatprep.mubr.msk.bf16.mxu0 %vm3151_vm0, %v3150_v0 }
 0x12c   : > { %2449 = vmatpush3.bf16.msra.mxu0 %v2752_v22 }
 0x12d   : > { %2450 = vmatprep.subr.bf16.mxu0 %v3150_v0 }
 0x130   : > { %2451 = vmatpush3.bf16.msra.mxu0 %v2753_v23 }
 0x131   : > { %2452 = vmatprep.subr.bf16.mxu0 %v3150_v0 }
 0x134   : > { %2453 = vmatpush3.bf16.msra.mxu0 %v2754_v24 }
 0x135   : > { %2454 = vmatprep.subr.bf16.mxu0 %v3150_v0 }
 0x138   : > { %2455 = vmatpush3.bf16.msra.mxu0 %v2755_v25 }
 0x139   : > { %2456 = vmatprep.subr.bf16.mxu0 %v3150_v0 }
 0x13c   : > { %2457 = vmatpush3.bf16.msra.mxu0 %v2756_v37 }
 0x13d   : > { %2458 = vmatprep.subr.bf16.mxu0 %v3150_v0 }
 0x140   : > { %2459 = vmatpush3.bf16.msra.mxu0 %v2757_v43 }
 0x141   : > { %2460 = vmatprep.subr.bf16.mxu0 %v3150_v0 }
 0x144   : > { %2461 = vmatpush3.bf16.msra.mxu0 %v2758_v44 }
 0x145   : > { %2462 = vmatprep.subr.bf16.mxu0 %v3150_v0 }
 0x148   : > { %2463 = vmatpush3.bf16.msra.mxu0 %v2759_v46 }
 0x149   : > { %2492 = vmatprep.subr.bf16.mxu0 %v3150_v0 }
 0x14b   : > { %2465 = vmatmul.mubr.bf16.vlgmr.msra.gmra.mrb[4].mxu0 %v3645_v20 }
 0x14c   : > { %2494 = vmatprep.mubr.msk.bf16.mxu0 %vm3151_vm0, %v3150_v0 }
 0x1fd   : > { %v823_v27 = vpop.f32.mrb[0].mxu1  ;;  %v710_v30 = vpop.f32.mrb[0].mxu0 }
 0x1fe   : > { %v2446_v28 = vpop.f32.mrb[1].mxu1  ;;  %v824_v31 = vadd.f32 %v2248_v26, %v823_v27  ;;  %v2426_v34 = vpop.f32.mrb[1].mxu0  ;;  %v711_v41 = vadd.f32 %v2238_v35, %v710_v30 }
 0x1ff   : > { %v826_v29 = vpop.f32.mrb[2].mxu1  ;;  %v713_v36 = vpop.f32.mrb[2].mxu0 }
 0x200   : > { %v827_v32 = vadd.f32 %v2248_v26, %v826_v29  ;;  %v2447_v33 = vpop.f32.mrb[3].mxu1  ;;  %v2427_v40 = vpop.f32.mrb[3].mxu0  ;;  %v954_v45 = vpack.c.bf16 %v711_v41, %v711_v41 }
 0x202   : > { %v2711_v38 = vpack.i.bf16 %v827_v32, %v824_v31  ;;  %v978_v39 = vpack.c.bf16 %v827_v32, %v824_v31 }
 0x204   : > { %2712 = vrot.lane.b32.xlu1 %v2711_v38, %s3152_s2  ;;  %2707 = vrot.lane.b32.xlu0 %v2711_v38, %s3153_s8  ;;  %v1011_v42 = vsel %vm1006_vm1, %v978_v39, 0 }
 0x205   : > { %2469 = vmatpush3.bf16.xpose.msra.mxu1 %v1011_v42 }
 0x206   : > { %2474 = vmatprep.subr.bf16.mxu1 %v3150_v0 }
 0x208   : > { %945 = vrot.lane.b32.xlu0 %v711_v41, %s3153_s8  ;;  %948 = vrot.lane.b32.xlu1 %v711_v41, %s3152_s2 }
 0x20c   : > { %2717 = vrot.lane.b32.xlu0 %v2711_v38, %s3154_s1  ;;  %2471 = vmatmul.mubr.msk.bf16.vlgmr.msra.gmra.mrb[4].mxu1 %vm1006_vm1, %v954_v45 }
 0x20d   : > { %951 = vrot.lane.b32.xlu1 %v711_v41, %s3154_s1  ;;  %2476 = vmatprep.mubr.msk.bf16.mxu1 %vm3151_vm0, %v3150_v0 }
 0x21e   : > { %v937_v11 = vpop.f32.mrb[4].mxu0 }
 0x21f   : > { %v2466_v12 = vpop.f32.mrb[5].mxu0  ;;  %v938_v16 = vadd.f32 %v2258_v15, %v937_v11 }
 0x220   : > { %v940_v13 = vpop.f32.mrb[6].mxu0 }
 0x221   : > { %v2467_v14 = vpop.f32.mrb[7].mxu0  ;;  %v941_v17 = vadd.f32 %v2258_v15, %v940_v13 }
 0x223   : > { %v1002_v18 = vpack.c.bf16 %v941_v17, %v938_v16  ;;  %v2721_v35 = vpack.i.bf16 %v941_v17, %v938_v16 }
 0x225   : > { %2493 = vmatpush3.bf16.msra.mxu0 %v1002_v18 }
 0x226   : > { %2504 = vmatprep.subr.bf16.mxu0 %v3150_v0 }
 0x276   : > { %v2708_v47 = vpop.permute.xlu0 %2707  ;;  %v2713_v50 = vpop.permute.xlu1 %2712 }
 0x277   : > { %v2710_v48 = vunpack.i.h.bf16 %v2708_v47  ;;  %v2709_v49 = vunpack.i.l.bf16 %v2708_v47  ;;  %v2715_v53 = vunpack.i.h.bf16 %v2713_v50  ;;  %v2714_v54 = vunpack.i.l.bf16 %v2713_v50 }
 0x279   : > { %v979_v51 = vpack.c.bf16 %v2710_v48, %v2709_v49  ;;  %v980_v56 = vpack.c.bf16 %v2715_v53, %v2714_v54 }
 0x27a   : > { %v946_v52 = vpop.permute.xlu0 %945  ;;  %v949_v63 = vpop.permute.xlu1 %948 }
 0x27b   : > { %v1057_v55 = vsel %vm1006_vm1, %v979_v51, 0  ;;  %v955_v57 = vpack.c.bf16 %v946_v52, %v946_v52  ;;  %v1103_v61 = vsel %vm1006_vm1, %v980_v56, 0  ;;  %v956_v1 = vpack.c.bf16 %v949_v63, %v949_v63 }
 0x27c   : > { %2475 = vmatpush3.bf16.xpose.msra.mxu1 %v1057_v55 }
 0x27d   : > { %2480 = vmatprep.subr.bf16.mxu1 %v3150_v0 }
 0x27e   : > { %v2718_v58 = vpop.permute.xlu0 %2717 }
 0x27f   : > { %v2720_v59 = vunpack.i.h.bf16 %v2718_v58  ;;  %v2719_v60 = vunpack.i.l.bf16 %v2718_v58  ;;  %v952_v3 = vpop.permute.xlu1 %951 }
 0x280   : > { %v957_v4 = vpack.c.bf16 %v952_v3, %v952_v3 }
 0x281   : > { %v981_v62 = vpack.c.bf16 %v2720_v59, %v2719_v60 }
 0x283   : > { %2477 = vmatmul.mubr.msk.bf16.vlgmr.msra.gmra.mrb[8].mxu1 %vm1006_vm1, %v955_v57  ;;  %v1149_v2 = vsel %vm1006_vm1, %v981_v62, 0 }
 0x284   : > { %2481 = vmatpush3.bf16.xpose.msra.mxu1 %v1103_v61  ;;  %2482 = vmatprep.mubr.msk.bf16.mxu1 %vm3151_vm0, %v3150_v0 }
 0x285   : > { %2486 = vmatprep.subr.bf16.mxu1 %v3150_v0 }
 0x28b   : > { %2483 = vmatmul.mubr.msk.bf16.vlgmr.msra.gmra.mrb[12].mxu1 %vm1006_vm1, %v956_v1 }
 0x28c   : > { %2487 = vmatpush3.bf16.xpose.msra.mxu1 %v1149_v2  ;;  %2488 = vmatprep.mubr.msk.bf16.mxu1 %vm3151_vm0, %v3150_v0 }
 0x28d   : > { %2498 = vmatprep.subr.bf16.mxu1 %v3150_v0 }
 0x293   : > { %2489 = vmatmul.mubr.msk.bf16.vlgmr.msra.gmra.mrb[16].mxu1 %vm1006_vm1, %v957_v4 }
 0x294   : > { %2500 = vmatprep.mubr.msk.bf16.mxu1 %vm3151_vm0, %v3150_v0 }
 0x2df   : > { %v1047_v5 = vpop.f32.mrb[4].mxu1 }
 0x2e0   : > { %v1191_v6 = vmul.f32 0.17677669, %v1047_v5  ;;  %v2472_v7 = vpop.f32.mrb[5].mxu1 }
 0x2e1   : > { %v1050_v8 = vpop.f32.mrb[6].mxu1 }
 0x2e2   : > { %v1196_v9 = vsel %vm1195_vm2, %v1191_v6, -inf  ;;  %v2473_v10 = vpop.f32.mrb[7].mxu1 }
 0x2e3   : > { %1197 = vmax.xlane.f32.xlu0 %v1196_v9 }
 0x356   : > { %v1093_v20 = vpop.f32.mrb[8].mxu1 }
 0x357   : > { %v1192_v21 = vmul.f32 0.17677669, %v1093_v20  ;;  %v2478_v22 = vpop.f32.mrb[9].mxu1 }
 0x358   : > { %v1096_v23 = vpop.f32.mrb[10].mxu1 }
 0x359   : > { %v2479_v24 = vpop.f32.mrb[11].mxu1  ;;  %v1199_v25 = vsel %vm1195_vm2, %v1192_v21, -inf }
 0x35a   : > { %1200 = vmax.xlane.f32.xlu1 %v1199_v25  ;;  %v2761_v25 = vld [vmem:[#allocation8 + $0x8] sm:$0xff]  }
 0x35e   : > { %v1139_v26 = vpop.f32.mrb[12].mxu1 }
 0x35f   : > { %v1193_v27 = vmul.f32 0.17677669, %v1139_v26  ;;  %v2484_v28 = vpop.f32.mrb[13].mxu1  ;;  %v2762_v26 = vld [vmem:[#allocation8 + $0x10] sm:$0xff]  }
 0x360   : > { %v1142_v29 = vpop.f32.mrb[14].mxu1  ;;  %v2763_v28 = vld [vmem:[#allocation8 + $0x18] sm:$0xff]  }
 0x361   : > { %v2485_v30 = vpop.f32.mrb[15].mxu1  ;;  %v1202_v31 = vsel %vm1195_vm2, %v1193_v27, -inf }
 0x362   : > { %1203 = vmax.xlane.f32.xlu0 %v1202_v31  ;;  %v2764_v30 = vld [vmem:[#allocation8 + $0x20] sm:$0xff]  }
 0x366   : > { %v1185_v32 = vpop.f32.mrb[16].mxu1 }
 0x367   : > { %v1194_v33 = vmul.f32 0.17677669, %v1185_v32  ;;  %v2490_v34 = vpop.f32.mrb[17].mxu1 }
 0x368   : > { %v1188_v36 = vpop.f32.mrb[18].mxu1 }
 0x369   : > { %v2491_v37 = vpop.f32.mrb[19].mxu1  ;;  %v1205_v38 = vsel %vm1195_vm2, %v1194_v33, -inf }
 0x36a   : > { %1206 = vmax.xlane.f32.xlu0 %v1205_v38  ;;  %v2766_v37 = vld [vmem:[#allocation8 + $0x30] sm:$0xff]  }
 0x36b   : > { %2722 = vrot.lane.b32.xlu1 %v2721_v35, %s3153_s8  ;;  %s3926_s8 = sld [smem:[#allocation37_spill]] }
 0x370   : > { %v1198_v39 = vpop.xlane.xlu0 %1197 }
 0x371   : > { %v1208_v40 = vsub.f32 %v1191_v6, %v1198_v39 }
 0x373   : > { %v1212_v41 = vmul.f32 1.442695, %v1208_v40 }
 0x375   : > { %2808 = vpow2.f32 %v1212_v41 }
 0x37f   : > { %v2809_v42 = vpop.eup %2808 }
 0x380   : > { %v1220_v43 = vsel %vm1195_vm2, %v2809_v42, 0.0 }
 0x38f   : > { %1221 = vadd.xlane.f32.xlu1 %v1220_v43 }
 0x3e7   : > { %v1201_v44 = vpop.xlane.xlu1 %1200 }
 0x3e8   : > { %v1209_v45 = vsub.f32 %v1192_v21, %v1201_v44  ;;  %v2760_v21 = vld [vmem:[#allocation8] sm:$0xff]  }
 0x3ea   : > { %v1214_v46 = vmul.f32 1.442695, %v1209_v45 }
 0x3eb   : > { %v2723_v47 = vpop.permute.xlu1 %2722 }
 0x3ec   : > { %2810 = vpow2.f32 %v1214_v46  ;;  %v2725_v48 = vunpack.i.h.bf16 %v2723_v47  ;;  %v2724_v49 = vunpack.i.l.bf16 %v2723_v47 }
 0x3ee   : > { %v1003_v50 = vpack.c.bf16 %v2725_v48, %v2724_v49 }
 0x3ef   : > { %v1204_v51 = vpop.xlane.xlu0 %1203 }
 0x3f0   : > { %v1210_v52 = vsub.f32 %v1193_v27, %v1204_v51  ;;  %2499 = vmatpush3.bf16.msra.mxu1 %v1003_v50 }
 0x3f1   : > { %2510 = vmatprep.subr.bf16.mxu1 %v3150_v0 }
 0x3f2   : > { %v1216_v53 = vmul.f32 1.442695, %v1210_v52 }
 0x3f4   : > { %2812 = vpow2.f32 %v1216_v53 }
 0x3f6   : > { %v2811_v54 = vpop.eup %2810 }
 0x3f7   : > { %v1207_v55 = vpop.xlane.xlu0 %1206  ;;  %v1223_v56 = vsel %vm1195_vm2, %v2811_v54, 0.0 }
 0x3f8   : > { %v1211_v57 = vsub.f32 %v1194_v33, %v1207_v55  ;;  %1224 = vadd.xlane.f32.xlu0 %v1223_v56 }
 0x3fa   : > { %v1218_v58 = vmul.f32 1.442695, %v1211_v57 }
 0x3fc   : > { %2814 = vpow2.f32 %v1218_v58 }
 0x3fe   : > { %v2813_v59 = vpop.eup %2812 }
 0x3ff   : > { %v1226_v60 = vsel %vm1195_vm2, %v2813_v59, 0.0 }
 0x400   : > { %1227 = vadd.xlane.f32.xlu1 %v1226_v60 }
 0x406   : > { %v2815_v61 = vpop.eup %2814 }
 0x407   : > { %v1229_v62 = vsel %vm1195_vm2, %v2815_v61, 0.0 }
 0x408   : > { %1230 = vadd.xlane.f32.xlu0 %v1229_v62 }
 0x411   : > { %2732 = vrot.lane.b32.xlu1 %v2721_v35, %s3154_s1  ;;  %s3921_s1 = sld [smem:[#allocation33_spill]] }
 0x41c   : > { %v1222_v63 = vpop.xlane.xlu1 %1221 }
 0x41d   : > { %2816 = vrcp.f32 %v1222_v63 }
 0x41e   : > { %2727 = vrot.lane.b32.xlu0 %v2721_v35, %s3152_s2  ;;  %v2765_v35 = vld [vmem:[#allocation8 + $0x28] sm:$0xff]  }
 0x427   : > { %v2817_v1 = vpop.eup %2816 }
 0x428   : > { %v1236_v2 = vmul.f32 %v2817_v1, %v2809_v42  ;;  %v2767_v42 = vld [vmem:[#allocation8 + $0x38] sm:$0xff]  }
 0x42a   : > { %v1240_v3 = vpack.c.bf16 %v1236_v2, %v1236_v2 }
 0x42c   : > { %2495 = vmatmul.mubr.msk.bf16.vlgmr.msra.gmra.mrb[8].mxu0 %vm1195_vm2, %v1240_v3 }
 0x42d   : > { %2506 = vmatprep.mubr.msk.bf16.mxu0 %vm3151_vm0, %v3150_v0 }
 0x485   : > { %v1225_v4 = vpop.xlane.xlu0 %1224 }
 0x486   : > { %2818 = vrcp.f32 %v1225_v4  ;;  %v2287_v4 = vld [vmem:[%s3918_s25] ss:$0 sm:$0xff]  ;;  %s3924_s25 = sld [smem:[#allocation20_spill]] }
 0x48c   : > { %s2066_s6 = sadd.s32 %s3924_s25, %s2326_s13  ;;  %s3927_s25 = sld [smem:[#allocation38_spill]] }
 0x48d   : > { %v1228_v5 = vpop.xlane.xlu1 %1227 }
 0x48e   : > { %2820 = vrcp.f32 %v1228_v5 }
 0x490   : > { %v2819_v6 = vpop.eup %2818 }
 0x491   : > { %v1237_v7 = vmul.f32 %v2819_v6, %v2811_v54  ;;  %v2733_v8 = vpop.permute.xlu1 %2732 }
 0x492   : > { %v2735_v9 = vunpack.i.h.bf16 %v2733_v8  ;;  %v2734_v10 = vunpack.i.l.bf16 %v2733_v8 }
 0x493   : > { %v1241_v11 = vpack.c.bf16 %v1237_v7, %v1237_v7 }
 0x494   : > { %v1005_v12 = vpack.c.bf16 %v2735_v9, %v2734_v10 }
 0x495   : > { %v1231_v13 = vpop.xlane.xlu0 %1230  ;;  %2501 = vmatmul.mubr.msk.bf16.vlgmr.msra.gmra.mrb[20].mxu1 %vm1195_vm2, %v1241_v11  ;;  %v2768_v11 = vld [vmem:[#allocation10] ss:$8 sps:$4 sm:$0xff]  }
 0x496   : > { %2822 = vrcp.f32 %v1231_v13  ;;  %2511 = vmatpush3.bf16.msra.mxu1 %v1005_v12  ;;  %2512 = vmatprep.mubr.msk.bf16.mxu1 %vm3151_vm0, %v3150_v0  ;;  %v2770_v12 = vld [vmem:[#allocation10 + $0x4] ss:$8 sps:$4 sm:$0xff]   ;;  %v2773_v13 = vld [vmem:[#allocation10 + $0x14] ss:$8 sps:$4 sm:$0xff]  }
 0x497   : > { %2524 = vmatprep.subr.bf16.mxu1 %v3150_v0 }
 0x498   : > { %v2821_v14 = vpop.eup %2820 }
 0x499   : > { %v2728_v15 = vpop.permute.xlu0 %2727  ;;  %v1238_v18 = vmul.f32 %v2821_v14, %v2813_v59  ;;  %v2771_v14 = vld [vmem:[#allocation10 + $0x10] ss:$8 sps:$4 sm:$0xff]  }
 0x49a   : > { %v2730_v16 = vunpack.i.h.bf16 %v2728_v15  ;;  %v2729_v17 = vunpack.i.l.bf16 %v2728_v15  ;;  %v2776_v15 = vld [vmem:[#allocation10 + $0x24] ss:$8 sps:$4 sm:$0xff]  }
 0x49b   : > { %v1242_v22 = vpack.c.bf16 %v1238_v18, %v1238_v18 }
 0x49c   : > { %v1004_v20 = vpack.c.bf16 %v2730_v16, %v2729_v17  ;;  %v2774_v16 = vld [vmem:[#allocation10 + $0x20] ss:$8 sps:$4 sm:$0xff]  }
 0x49e   : > { %2505 = vmatpush3.bf16.msra.mxu0 %v1004_v20 }
 0x49f   : > { %2516 = vmatprep.subr.bf16.mxu0 %v3150_v0 }
 0x4a0   : > { %v2823_v23 = vpop.eup %2822 }
 0x4a1   : > { %v1239_v24 = vmul.f32 %v2823_v23, %v2815_v61  ;;  %2507 = vmatmul.mubr.msk.bf16.vlgmr.msra.gmra.mrb[12].mxu0 %vm1195_vm2, %v1242_v22  ;;  %v2779_v22 = vld [vmem:[#allocation10 + $0x34] ss:$8 sps:$4 sm:$0xff]   ;;  %v2782_v23 = vld [vmem:[#allocation10 + $0x44] ss:$8 sps:$4 sm:$0xff]  }
 0x4a2   : > { %2517 = vmatpush3.bf16.msra.mxu0 %v2760_v21  ;;  %2520 = vmatprep.mubr.msk.bf16.mxu0 %vm3151_vm0, %v3150_v0 }
 0x4a3   : > { %v1243_v27 = vpack.c.bf16 %v1239_v24, %v1239_v24  ;;  %2518 = vmatprep.subr.bf16.mxu0 %v3150_v0  ;;  %v2780_v24 = vld [vmem:[#allocation10 + $0x40] ss:$8 sps:$4 sm:$0xff]  }
 0x4a5   : > { %2513 = vmatmul.mubr.msk.bf16.vlgmr.msra.gmra.mrb[24].mxu1 %vm1195_vm2, %v1243_v27  ;;  %v2788_v27 = vld [vmem:[#allocation10 + $0x64] ss:$8 sps:$4 sm:$0xff]  }
 0x4a6   : > { %2519 = vmatpush3.bf16.msra.mxu0 %v2761_v25  ;;  %2525 = vmatpush3.bf16.msra.mxu1 %v2762_v26  ;;  %v2785_v25 = vld [vmem:[#allocation10 + $0x54] ss:$8 sps:$4 sm:$0xff]   ;;  %v2783_v26 = vld [vmem:[#allocation10 + $0x50] ss:$8 sps:$4 sm:$0xff]  }
 0x4a7   : > { %2526 = vmatprep.subr.bf16.mxu1 %v3150_v0  ;;  %2528 = vmatprep.mubr.msk.bf16.mxu1 %vm3151_vm0, %v3150_v0 }
 0x4a8   : > { %2532 = vmatprep.subr.bf16.mxu0 %v3150_v0 }
 0x4aa   : > { %2527 = vmatpush3.bf16.msra.mxu1 %v2763_v28  ;;  %v2786_v28 = vld [vmem:[#allocation10 + $0x60] ss:$8 sps:$4 sm:$0xff]  }
 0x4ab   : > { %2540 = vmatprep.subr.bf16.mxu1 %v3150_v0 }
 0x4ff   : > { %v1281_v29 = vpop.f32.mrb[8].mxu0 }
 0x500   : > { %v1416_v31 = vpack.c.bf16 %v1281_v29, %v1281_v29  ;;  %v2496_v32 = vpop.f32.mrb[9].mxu0  ;;  %v2791_v29 = vld [vmem:[#allocation10 + $0x74] ss:$8 sps:$4 sm:$0xff]  }
 0x501   : > { %v1284_v33 = vpop.f32.mrb[10].mxu0  ;;  %v2792_v32 = vld [vmem:[#allocation11 + $0x40] sm:$0xff]  }
 0x502   : > { %v2497_v34 = vpop.f32.mrb[11].mxu0  ;;  %2521 = vmatmul.mubr.msk.bf16.vlgmr.msra.gmra.mrb[16].mxu0 %vm1006_vm1, %v1416_v31  ;;  %v3155_v31 = vmov 0   ;;  %v2793_v33 = vld [vmem:[#allocation11] sm:$0xff]  }
 0x503   : > { %2533 = vmatpush3.bf16.msra.mxu0 %v2764_v30  ;;  %2536 = vmatprep.mubr.msk.bf16.mxu0 %vm3151_vm0, %v3150_v0  ;;  %v2789_v30 = vld [vmem:[#allocation10 + $0x70] ss:$8 sps:$4 sm:$0xff]   ;;  %v2794_v34 = vld [vmem:[#allocation11 + $0x48] sm:$0xff]  }
 0x504   : > { %2534 = vmatprep.subr.bf16.mxu0 %v3150_v0 }
 0x507   : > { %2535 = vmatpush3.bf16.msra.mxu0 %v2765_v35  ;;  %v2795_v35 = vld [vmem:[#allocation11 + $0x8] sm:$0xff]  }
 0x508   : > { %1805 = vmatprep.subr.bf16.mxu0 %v2770_v12  ;;  %v2306_v12 = vld [vmem:[%s3922_s0] ss:$0 sm:$0xff] }
 0x568   : > { %v1324_v36 = vpop.f32.mrb[20].mxu1 }
 0x569   : > { %v1417_v38 = vpack.c.bf16 %v1324_v36, %v1324_v36  ;;  %v2502_v39 = vpop.f32.mrb[21].mxu1  ;;  %v2796_v36 = vld [vmem:[#allocation11 + $0x50] sm:$0xff]  }
 0x56a   : > { %v1327_v40 = vpop.f32.mrb[22].mxu1  ;;  %v2799_v39 = vld [vmem:[#allocation11 + $0x18] sm:$0xff]  }
 0x56b   : > { %v2503_v41 = vpop.f32.mrb[23].mxu1  ;;  %2529 = vmatmul.mubr.msk.bf16.vlgmr.msra.gmra.mrb[28].mxu1 %vm1006_vm1, %v1417_v38  ;;  %v2798_v38 = vld [vmem:[#allocation11 + $0x58] sm:$0xff]   ;;  %v2800_v40 = vld [vmem:[#allocation11 + $0x60] sm:$0xff]  }
 0x56c   : > { %2541 = vmatpush3.bf16.msra.mxu1 %v2766_v37  ;;  %2544 = vmatprep.mubr.msk.bf16.mxu1 %vm3151_vm0, %v3150_v0  ;;  %v2797_v37 = vld [vmem:[#allocation11 + $0x10] sm:$0xff]   ;;  %v2801_v41 = vld [vmem:[#allocation11 + $0x20] sm:$0xff]  }
 0x56d   : > { %2542 = vmatprep.subr.bf16.mxu1 %v3150_v0 }
 0x570   : > { %2543 = vmatpush3.bf16.msra.mxu1 %v2767_v42  ;;  %v2802_v42 = vld [vmem:[#allocation11 + $0x68] sm:$0xff]  }
 0x571   : > { %2386 = vmatprep.subr.bf16.mxu1 %v2792_v32 }
 0x574   : > { %v1367_v43 = vpop.f32.mrb[12].mxu0 }
 0x575   : > { %v1418_v44 = vpack.c.bf16 %v1367_v43, %v1367_v43  ;;  %v2508_v45 = vpop.f32.mrb[13].mxu0  ;;  %v2803_v43 = vld [vmem:[#allocation11 + $0x28] sm:$0xff]  }
 0x576   : > { %v1370_v46 = vpop.f32.mrb[14].mxu0 }
 0x577   : > { %v2509_v47 = vpop.f32.mrb[15].mxu0  ;;  %2537 = vmatmul.mubr.msk.bf16.vlgmr.msra.gmra.mrb[20].mxu0 %vm1006_vm1, %v1418_v44 }
 0x578   : > { %v1410_v48 = vpop.f32.mrb[24].mxu1  ;;  %1806 = vmatpush1.bf16.msra.mxu0 %v2768_v11  ;;  %1837 = vmatprep.mubr.bf16.mxu0 %v3155_v31 }
 0x579   : > { %v1419_v49 = vpack.c.bf16 %v1410_v48, %v1410_v48  ;;  %v2514_v50 = vpop.f32.mrb[25].mxu1  ;;  %1807 = vmatprep.subr.bf16.mxu0 %v2773_v13  ;;  %v2288_v48 = vld [vmem:[%s3919_s24] ss:$0 sm:$0xff]  ;;  %s2055_s24 = scalar_lea.sflag [#allocation4], %s3586_s12 }
 0x57a   : > { %v1413_v51 = vpop.f32.mrb[26].mxu1  ;;  %v2289_v50 = vld [vmem:[%s3920_s10] ss:$0 sm:$0xff] }
 0x57b   : > { %v2515_v52 = vpop.f32.mrb[27].mxu1  ;;  %2545 = vmatmul.mubr.msk.bf16.vlgmr.msra.gmra.mrb[32].mxu1 %vm1006_vm1, %v1419_v49 }
 0x57c   : > { %1808 = vmatpush1.bf16.msra.mxu0 %v2771_v14  ;;  %2387 = vmatpush3.bf16.msra.mxu1 %v2793_v33 }
 0x57d   : > { %1809 = vmatprep.subr.bf16.mxu0 %v2776_v15  ;;  %2388 = vmatprep.subr.bf16.mxu1 %v2794_v34 }
 0x580   : > { %1810 = vmatpush1.bf16.msra.mxu0 %v2774_v16  ;;  %2389 = vmatpush3.bf16.msra.mxu1 %v2795_v35 }
 0x581   : > { %1811 = vmatprep.subr.bf16.mxu0 %v2779_v22  ;;  %2390 = vmatprep.subr.bf16.mxu1 %v2796_v36 }
 0x584   : > { %2391 = vmatpush3.bf16.msra.mxu1 %v2797_v37 }
 0x585   : > { %2392 = vmatprep.subr.bf16.mxu1 %v2798_v38 }
 0x588   : > { %2393 = vmatpush3.bf16.msra.mxu1 %v2799_v39 }
 0x589   : > { %2394 = vmatprep.subr.bf16.mxu1 %v2800_v40 }
 0x58c   : > { %2395 = vmatpush3.bf16.msra.mxu1 %v2801_v41 }
 0x58d   : > { %2396 = vmatprep.subr.bf16.mxu1 %v2802_v42 }
 0x590   : > { %2397 = vmatpush3.bf16.msra.mxu1 %v2803_v43 }
 0x5d5   : > { %v1485_v53 = vpop.f32.mrb[16].mxu0 }
 0x5d6   : > { %v2522_v54 = vpop.f32.mrb[17].mxu0 }
 0x5d7   : > { %v1488_v55 = vpop.f32.mrb[18].mxu0  ;;  %v2804_v54 = vld [vmem:[#allocation11 + $0x70] sm:$0xff]  }
 0x5d8   : > { %v2523_v56 = vpop.f32.mrb[19].mxu0  ;;  %v2805_v55 = vld [vmem:[#allocation11 + $0x30] sm:$0xff]   ;;  %2398 = vmatprep.subr.bf16.mxu1 %v2804_v54 }
 0x5d9   : > { %2399 = vmatpush3.bf16.msra.mxu1 %v2805_v55  ;;  %v2806_v56 = vld [vmem:[#allocation11 + $0x78] sm:$0xff]  }
 0x5da   : > { %2400 = vmatprep.subr.bf16.mxu1 %v2806_v56 }
 0x63e   : > { %v1540_v0 = vpop.f32.mrb[28].mxu1 }
 0x63f   : > { %v1656_v57 = vadd.f32 %v1540_v0, %v1485_v53  ;;  %v2530_v58 = vpop.f32.mrb[29].mxu1  ;;  %v2807_v0 = vld [vmem:[#allocation11 + $0x38] sm:$0xff]  }
 0x640   : > { %v1543_v59 = vpop.f32.mrb[30].mxu1  ;;  %2401 = vmatpush3.bf16.msra.mxu1 %v2807_v0 }
 0x641   : > { %v2531_v60 = vpop.f32.mrb[31].mxu1 }
 0x642   : > { %v1713_v60 = vld [vmem:[%s3921_s1] sm:$0x3]  ;;  %s2327_s1 = sshll.u32 %s2066_s6, 7  ;;  %s3004_s6 = sshll.u32 %s3156_s19, 4  ;;  %s3005_s6 = int_to_ptr.vmem [resolvable:$false] %s3004_s6 }
 0x643   : > { %s3773_s13 = scalar_lea.hbm %s3927_s25, %s2327_s1  ;;  %p3007_p8 = scmp.lt.s32.totalorder %s3775_s4, %s3005_s6 }
 0x64a   : > { %v1595_v61 = vpop.f32.mrb[20].mxu0 }
 0x64b   : > { %v1657_v62 = vadd.f32 %v1656_v57, %v1595_v61  ;;  %v2538_v63 = vpop.f32.mrb[21].mxu0  ;;  %v1715_v57 = vlaneseq }
 0x64c   : > { %v1598_v1 = vpop.f32.mrb[22].mxu0 }
 0x64d   : > { %v2539_v2 = vpop.f32.mrb[23].mxu0  ;;  %v1716_v58 = vshrl.u32 %v1715_v57, 7 }
 0x64e   : > { %v1650_v3 = vpop.f32.mrb[32].mxu1 }
 0x64f   : > { %v1658_v5 = vadd.f32 %v1657_v62, %v1650_v3  ;;  %v2546_v6 = vpop.f32.mrb[33].mxu1  ;;  %v1717_v59 = vsub.s32 0, %v1716_v58  ;;  %v1721_v61 = vsub.s32 1, %v1716_v58 }
 0x650   : > { %v1653_v7 = vpop.f32.mrb[34].mxu1 }
 0x651   : > { %v1666_v8 = vadd.f32 %v2287_v4, %v1658_v5  ;;  %v2547_v9 = vpop.f32.mrb[35].mxu1  ;;  %v1718_v62 = vrot.slane %v1713_v60, %v1717_v59  ;;  %v1722_v63 = vrot.slane %v1713_v60, %v1721_v61 }
 0x653   : > { %v1667_v10 = vadd.f32 %v1666_v8, %v3642_v19  ;;  %v2777_v19 = vld [vmem:[#allocation10 + $0x30] ss:$8 sps:$4 sm:$0xff]  }
 0x654   : > { %1812 = vmatpush1.bf16.msra.mxu0 %v2777_v19 }
 0x655   : > { %1668 = vadd.xlane.f32.xlu1 %v1667_v10  ;;  %1813 = vmatprep.subr.bf16.mxu0 %v2782_v23 }
 0x658   : > { %1814 = vmatpush1.bf16.msra.mxu0 %v2780_v24 }
 0x659   : > { %1815 = vmatprep.subr.bf16.mxu0 %v2785_v25 }
 0x65c   : > { %1816 = vmatpush1.bf16.msra.mxu0 %v2783_v26 }
 0x65d   : > { %1817 = vmatprep.subr.bf16.mxu0 %v2788_v27  ;;  %v2323_v27 = vld [vmem:[%s3925_s14] ss:$0 sm:$0xff]  ;;  %s3006_s14 = scalar_lea.vmem %s3005_s6, 256 }
 0x65e   : > { %p3008_p7 = scmp.lt.s32.totalorder %s3006_s14, %s3000_s7 }
 0x660   : > { %1818 = vmatpush1.bf16.msra.mxu0 %v2786_v28  ;;  %p3009_p6 = por %p3008_p7, %p3007_p8 }
 0x661   : > { %1819 = vmatprep.subr.bf16.mxu0 %v2791_v29  ;;  %v2324_v29 = vld [vmem:[%s3926_s8] ss:$0 sm:$0xff] }
 0x662   : > { %p3010_p11 = pnand %p3009_p6, %p3003_p1 }
 0x664   : > { %1820 = vmatpush1.bf16.msra.mxu0 %v2789_v30 }
 0x6e2   : > { %v1669_v17 = vpop.xlane.xlu1 %1668 }
 0x6e3   : > { %v1671_v18 = vmul.f32 0.0078125, %v1669_v17 }
 0x6e5   : > { %v1672_v20 = vsub.f32 %v1667_v10, %v1671_v18 }
 0x6e7   : > { %v1673_v21 = vmul.f32 %v1672_v20, %v1672_v20 }
 0x6e9   : > { %1674 = vadd.xlane.f32.xlu0 %v1673_v21 }
 0x776   : > { %v1675_v44 = vpop.xlane.xlu0 %1674 }
 0x777   : > { %v1676_v45 = vmul.f32 0.0078125, %v1675_v44 }
 0x779   : > { %v1677_v46 = vadd.f32 1e-05, %v1676_v45 }
 0x77b   : > { %2824 = vrsqrt.f32 %v1677_v46 }
 0x785   : > { %v2825_v47 = vpop.eup %2824 }
 0x786   : > { %v1679_v49 = vmul.f32 %v2825_v47, %v1672_v20 }
 0x788   : > { %v1687_v51 = vmul.f32 %v2288_v48, %v1679_v49 }
 0x78a   : > { %v1695_v52 = vadd.f32 %v2289_v50, %v1687_v51 }
 0x78c   : > { %v1696_v53 = vpack.c.bf16 %v1695_v52, %v1695_v52 }
 0x78e   : > { %1838 = vmatmul.mubr.bf16.vlgmr.msra.gmra.mrb[24].mxu0 %v1696_v53 }
 0x861   : > { %v1839_v1 = vpop.f32.mrb[24].mxu0 }
 0x862   : > { %v1840_v2 = vadd.f32 %v1839_v1, %v1718_v62  ;;  %v1841_v3 = vpop.f32.mrb[25].mxu0 }
 0x863   : > { %v1842_v4 = vadd.f32 %v1841_v3, %v1722_v63  ;;  %v1843_v5 = vpop.f32.mrb[26].mxu0 }
 0x864   : > { %v1846_v6 = vmax.f32 %v1840_v2, 0.0  ;;  %v1844_v7 = vpop.f32.mrb[27].mxu0 }
 0x865   : > { %v1847_v8 = vmax.f32 %v1842_v4, 0.0 }
 0x866   : > { %v1848_v10 = vpack.c.bf16 %v1846_v6, %v1846_v6 }
 0x867   : > { %v1849_v9 = vpack.c.bf16 %v1847_v8, %v1847_v8 }
 0x869   : > { %2017 = vmatprep.mubr.bf16.mxu1 %v1849_v9 }
 0x86a   : > { %2018 = vmatmul.mubr.bf16.vlgmr.msra.gmra.mrb[36].mxu1 %v1848_v10 }
 0x93d   : > { %v2402_v11 = vpop.f32.mrb[36].mxu1 }
 0x93e   : > { %v2403_v13 = vpop.f32.mrb[37].mxu1 }
 0x93f   : > { %v2404_v14 = vadd.f32 %v2403_v13, %v2402_v11  ;;  %v2405_v15 = vpop.f32.mrb[38].mxu1 }
 0x940   : > { %v2406_v16 = vpop.f32.mrb[39].mxu1 }
 0x941   : > { %v2020_v17 = vadd.f32 %v2404_v14, %v2306_v12 }
 0x943   : > { %v2025_v18 = vadd.f32 %v2020_v17, %v1695_v52 }
 0x945   : > { %2026 = vadd.xlane.f32.xlu0 %v2025_v18 }
 0x9d2   : > { %v2027_v20 = vpop.xlane.xlu0 %2026 }
 0x9d3   : > { %v2028_v21 = vmul.f32 0.0078125, %v2027_v20 }
 0x9d5   : > { %v2029_v22 = vsub.f32 %v2025_v18, %v2028_v21 }
 0x9d7   : > { %v2030_v19 = vmul.f32 %v2029_v22, %v2029_v22 }
 0x9d9   : > { %2031 = vadd.xlane.f32.xlu1 %v2030_v19 }
 0xa66   : > { %v2032_v23 = vpop.xlane.xlu1 %2031 }
 0xa67   : > { %v2033_v24 = vmul.f32 0.0078125, %v2032_v23 }
 0xa69   : > { %v2034_v25 = vadd.f32 1e-05, %v2033_v24 }
 0xa6b   : > { %2826 = vrsqrt.f32 %v2034_v25 }
 0xa75   : > { %v2827_v26 = vpop.eup %2826 }
 0xa76   : > { %v2036_v28 = vmul.f32 %v2827_v26, %v2029_v22 }
 0xa78   : > { %v2044_v30 = vmul.f32 %v2323_v27, %v2036_v28 }
 0xa7a   : > { %v2052_v31 = vadd.f32 %v2324_v29, %v2044_v30 }
 0xa7c   : > { %2053 = vst [vmem:[%s598_s27] sm:$0xff] %v2052_v31 }
 0xa7d   : > { %3013 = shalt.err (!%p3010_p11)
}
 0xa7e   : > { %s3014_s12 = scalar_lea.hbm %s3773_s13, 128  ;;  %s3018_s8 = scalar_lea.hbm %s3927_s25, 512 }
 0xa7f   : > { %p3015_p10 = scmp.ne.s32.totalorder %s3773_s13, %s3014_s12  ;;  %p3019_p12 = scmp.lt.u32.totalorder %s3773_s13, %s3927_s25 }
 0xa80   : > { %p3020_p9 = scmp.lt.u32.totalorder %s3018_s8, %s3014_s12  ;;  %p3022_p13 = scmp.lt.u32.totalorder %s3014_s12, %s3773_s13 }
 0xa81   : > { %p3016_p5 = pnand %p3015_p10, %p3928_p0 }
 0xa82   : > { %p3021_p3 = por %p3020_p9, %p3019_p12 }
 0xa83   : > { %p3017_p4 = pneg %p3016_p5 }
 0xa84   : > { %p3023_p2 = por %p3022_p13, %p3021_p3 }
 0xa86   : > { %p3024_p1 = pnand %p3023_p2, %p3017_p4 }
 0xa88   : > { %3027 = shalt.err (!%p3024_p1)
}
 0xa89   : > { %2568 = dma.vmem_to_hbm [thread:$0]  (%p3928_p0), %s3775_s4, 128, %s3773_s13, %s2055_s24  }
 0xa8a PF: > { %p2603_p8 = scmp.ge.s32.totalorder %s3138_s23, 2  ;;  %s2082_s0 = sand.u32 1, %s3110_s16  }
 0xa8b   : > { %p3929_p7 = scmp.ne.s32.totalorder %s3900_s20, 0  ;;  %s2083_s26 = scalar_lea.sflag [#allocation4], %s2082_s0 }
 0xa8d   : > { %p2591_p6 = pnand %p2603_p8, %p3929_p7 }
 0xa8f   : > { %3093 = dma.done.wait (!%p2591_p6), %s2083_s26, 128  }
 0xa90   : > { %3095 = vsyncadd (!%p2591_p6), %s2083_s26, 4294967168  ;;  %s35_s23 = sadd.s32 1, %s3138_s23   ;;  %s3930_s4 = sld [smem:[#allocation23_spill]] }
 0xa91   : > { %p32_p11 = scmp.ge.s32.totalorder %s35_s23, 6   ;;  %s3931_s29 = smov %s3102_s30 }
 0xa92   : > { %s3932_s30 = smov %s3106_s15  ;;  %s3933_s15 = smov %s3460_s5 }
 0xa93   : > { %s3934_s16 = smov %s3114_s17  ;;  %s3935_s17 = smov %s3118_s18 }
 0xa94   : > { %s3936_s18 = smov %s3463_s9  ;;  %s3937_s19 = smov %s3130_s21 }
 0xa95   : > { %s3938_s20 = smov %s3134_s22  ;;  %s3939_s21 = smov %s3942_s28 }
 0xa96   : > { %s3940_s22 = smov %s3930_s4  ;;  %34 = sbr.rel (!%p32_p11) target bundleno = 29 (0x1d), region = 154 }
 0xa9d   :  { %2088 = vsyncpa [#allocation3], 1 }
 0xa9e   :  { %2090 = vsyncpa [#allocation3 + $0x1], 1 }
 0xa9f   :  { %2091 = vsyncpa [#allocation6], 1 }
 0xaa0   :  { %2093 = vsyncpa [#allocation6 + $0x1], 1 }
 0xaa1   :  { %2094 = vsyncpa [#allocation9], 1 }
 0xaa2   :  { %2095 = vsyncpa [#allocation12], 1 }
 0xaa3   :  { %2096 = vsyncpa [#allocation4], 1 }
 0xaa4   :  { %2098 = vsyncpa [#allocation4 + $0x1], 1 }

</bundles_post_ra>
